<compile_context>
chip_gen: v7x
topology: tpu7x:2x2x1
jax: 0.10.0
libtpu: 0.0.40
codegen_flags: <defaults>
</compile_context>

<pallas_src>
import jax
import jax.numpy as jnp
from jax.experimental import pallas as pl
from jax.experimental.pallas import tpu as pltpu

OUT_CHANNELS = 50
NUM_LAYERS = 3
EDGE_TYPES = 2
HP = 128              # padded (lane-aligned) feature width


def ggnn_kernel(x_ref, adj_ref, w_ref, wih_ref, whh_ref, bi_ref, bhn_ref,
                lw_ref, lb_ref, out_ref):
    h = x_ref[...]                       # (NP, HP)
    adj = adj_ref[...]                   # (NP, NP)
    wih = wih_ref[...]                   # (HP, 3*HP)  gates r|z|n at 0/128/256
    whh = whh_ref[...]                   # (HP, 3*HP)
    bi = bi_ref[...]                     # (1, 3*HP)   b_ir+b_hr | b_iz+b_hz | b_in
    bhn = bhn_ref[...]                   # (1, HP)

    for layer in range(NUM_LAYERS):
        # message transform: m = h @ W[layer]
        m = jnp.dot(h, w_ref[layer], preferred_element_type=jnp.float32)
        # 'add' aggregation over edges as dense adjacency matmul.
        agg = jnp.dot(adj, m, preferred_element_type=jnp.float32)
        # Fused GRU gate matmuls (PyTorch gate order r, z, n).
        gi = jnp.dot(agg, wih, preferred_element_type=jnp.float32) + bi
        gh = jnp.dot(h, whh, preferred_element_type=jnp.float32)
        # 128-aligned gate slices: free, full-vreg extracts.
        r = jax.nn.sigmoid(gi[:, 0:HP] + gh[:, 0:HP])
        z = jax.nn.sigmoid(gi[:, HP:2 * HP] + gh[:, HP:2 * HP])
        n = jnp.tanh(gi[:, 2 * HP:3 * HP] + r * (gh[:, 2 * HP:3 * HP] + bhn))
        h = (1.0 - z) * n + z * h
    # ReLU + Linear (lane-dense 128-wide output store).
    h = jnp.maximum(h, 0.0)
    out_ref[...] = (jnp.dot(h, lw_ref[...], preferred_element_type=jnp.float32)
                    + lb_ref[...])


def ggnn_forward(x, edge_index, edge_attr, params):
    N, C = x.shape
    H = OUT_CHANNELS
    NP = max(8, ((N + 7) // 8) * 8)      # sublane-aligned node count

    # Edge embedding lookup (present in reference forward, result unused).
    _ = params["edge_embedding"][edge_attr]

    # Zero-pad input features up to HP (GatedGraphConv zero-pads to H; the
    # extra H..HP columns are zero weights/biases so they stay identically 0).
    x_pad = jnp.zeros((NP, HP), jnp.float32).at[:N, :C].set(x.astype(jnp.float32))

    # Dense adjacency for add-aggregation: adj[dst, src] = edge multiplicity.
    src, dst = edge_index[0], edge_index[1]
    adj = jnp.zeros((NP, NP), jnp.float32).at[dst, src].add(1.0)

    # Per-layer propagation weights, padded to (L, HP, HP).
    conv_w = jnp.zeros((NUM_LAYERS, HP, HP), jnp.float32).at[:, :H, :H].set(
        params["conv_w"])

    # GRU weights (PyTorch layout: gates = x @ W_ih.T + b_ih, order r,z,n),
    # fused into (HP, 3*HP) with each gate at a 128-lane-aligned column offset.
    wih, whh = params["gru_wih"], params["gru_whh"]
    bih, bhh = params["gru_bih"], params["gru_bhh"]
    wih_cat = jnp.zeros((HP, 3 * HP), jnp.float32)
    whh_cat = jnp.zeros((HP, 3 * HP), jnp.float32)
    for g in range(3):
        wih_cat = wih_cat.at[:H, g * HP:g * HP + H].set(wih[g * H:(g + 1) * H].T)
        whh_cat = whh_cat.at[:H, g * HP:g * HP + H].set(whh[g * H:(g + 1) * H].T)
    # Fold b_ir+b_hr and b_iz+b_hz; b_in goes on the input side; b_hn must stay
    # separate because it sits inside r*(...).
    bi_fused = jnp.zeros((1, 3 * HP), jnp.float32)
    bi_fused = bi_fused.at[0, 0:H].set(bih[0:H] + bhh[0:H])                  # r
    bi_fused = bi_fused.at[0, HP:HP + H].set(bih[H:2 * H] + bhh[H:2 * H])    # z
    bi_fused = bi_fused.at[0, 2 * HP:2 * HP + H].set(bih[2 * H:3 * H])       # n (input)
    bhn = jnp.zeros((1, HP), jnp.float32).at[0, :H].set(bhh[2 * H:3 * H])    # n (hidden)

    # Final Linear: y = x @ W.T + b, padded to lane-dense (HP, HP).
    lw = jnp.zeros((HP, HP), jnp.float32).at[:H, :H].set(params["lin_w"].T)
    lb = jnp.zeros((1, HP), jnp.float32).at[0, :H].set(params["lin_b"])

    inputs = (x_pad, adj, conv_w, wih_cat, whh_cat, bi_fused, bhn, lw, lb)

    vmem_spec = pl.BlockSpec(memory_space=pltpu.MemorySpace.VMEM)
    out_pad = pl.pallas_call(
        ggnn_kernel,
        out_shape=jax.ShapeDtypeStruct((NP, HP), jnp.float32),
        in_specs=[vmem_spec] * len(inputs),
        out_specs=vmem_spec,
    )(*inputs)
    return out_pad[:N, :H]


def ggnn_reference(x, edge_index, edge_attr, params):
    """Pure-JAX reference mirroring the PyTorch module, for validation."""
    N = x.shape[0]
    H = OUT_CHANNELS
    h = jnp.pad(x.astype(jnp.float32), ((0, 0), (0, H - x.shape[1])))
    src, dst = edge_index[0], edge_index[1]
    wih, whh = params["gru_wih"], params["gru_whh"]
    bih, bhh = params["gru_bih"], params["gru_bhh"]
    for i in range(NUM_LAYERS):
        m = h @ params["conv_w"][i]
        agg = jnp.zeros((N, H), jnp.float32).at[dst].add(m[src])
        gi = agg @ wih.T + bih
        gh = h @ whh.T + bhh
        r = jax.nn.sigmoid(gi[:, 0:H] + gh[:, 0:H])
        z = jax.nn.sigmoid(gi[:, H:2 * H] + gh[:, H:2 * H])
        n = jnp.tanh(gi[:, 2 * H:3 * H] + r * gh[:, 2 * H:3 * H])
        h = (1.0 - z) * n + z * h
    h = jnp.maximum(h, 0.0)
    return h @ params["lin_w"].T + params["lin_b"]


def init_params(key):
    H = OUT_CHANNELS
    ks = jax.random.split(key, 8)
    scale = 0.1
    return {
        "conv_w": scale * jax.random.normal(ks[0], (NUM_LAYERS, H, H), jnp.float32),
        "gru_wih": scale * jax.random.normal(ks[1], (3 * H, H), jnp.float32),
        "gru_whh": scale * jax.random.normal(ks[2], (3 * H, H), jnp.float32),
        "gru_bih": scale * jax.random.normal(ks[3], (3 * H,), jnp.float32),
        "gru_bhh": scale * jax.random.normal(ks[4], (3 * H,), jnp.float32),
        "lin_w": scale * jax.random.normal(ks[5], (H, H), jnp.float32),
        "lin_b": scale * jax.random.normal(ks[6], (H,), jnp.float32),
        "edge_embedding": scale * jax.random.normal(ks[7], (EDGE_TYPES, H), jnp.float32),
    }


if __name__ == "__main__":
    key = jax.random.PRNGKey(0)
    k_p, k_x = jax.random.split(key)

    params = init_params(k_p)

    # Small synthetic graph: 8 nodes, 16 input channels (< out_channels=50), 4 edges.
    num_nodes, in_channels = 8, 16
    x = jax.random.normal(k_x, (num_nodes, in_channels), jnp.float32)
    edge_index = jnp.array([[0, 1, 2, 3],
                            [1, 2, 3, 0]], dtype=jnp.int32)
    edge_attr = jnp.array([0, 0, 1, 1], dtype=jnp.int32)

    out = ggnn_forward(x, edge_index, edge_attr, params)
    jax.block_until_ready(out)
    assert out.shape == (num_nodes, OUT_CHANNELS)

    ref = ggnn_reference(x, edge_index, edge_attr, params)
    assert jnp.max(jnp.abs(out - ref)) < 1e-4

    print("KERNEL_OK")
</pallas_src>

<mosaic_0001>
module attributes {stable_mosaic.version = 11 : i64} {
  func.func @ggnn_kernel(%arg0: memref<8x128xf32, #tpu.memory_space<vmem>>, %arg1: memref<8x8xf32, #tpu.memory_space<vmem>>, %arg2: memref<3x128x128xf32, #tpu.memory_space<vmem>>, %arg3: memref<128x384xf32, #tpu.memory_space<vmem>>, %arg4: memref<128x384xf32, #tpu.memory_space<vmem>>, %arg5: memref<1x384xf32, #tpu.memory_space<vmem>>, %arg6: memref<1x128xf32, #tpu.memory_space<vmem>>, %arg7: memref<128x128xf32, #tpu.memory_space<vmem>>, %arg8: memref<1x128xf32, #tpu.memory_space<vmem>>, %arg9: memref<8x128xf32, #tpu.memory_space<vmem>>) attributes {dimension_semantics = [], scalar_prefetch = 0 : i64, scratch_operands = 0 : i64, tpu.core_type = #tpu.core_type<tc>} {
    %c0 = arith.constant 0 : index
    %c0_0 = arith.constant 0 : index
    %0 = vector.load %arg0[%c0, %c0_0] : memref<8x128xf32, #tpu.memory_space<vmem>>, vector<8x128xf32>
    %c0_1 = arith.constant 0 : index
    %c0_2 = arith.constant 0 : index
    %1 = vector.load %arg1[%c0_1, %c0_2] : memref<8x8xf32, #tpu.memory_space<vmem>>, vector<8x8xf32>
    %c0_3 = arith.constant 0 : index
    %c0_4 = arith.constant 0 : index
    %2 = vector.load %arg3[%c0_3, %c0_4] : memref<128x384xf32, #tpu.memory_space<vmem>>, vector<128x384xf32>
    %c0_5 = arith.constant 0 : index
    %c0_6 = arith.constant 0 : index
    %3 = vector.load %arg4[%c0_5, %c0_6] : memref<128x384xf32, #tpu.memory_space<vmem>>, vector<128x384xf32>
    %c0_7 = arith.constant 0 : index
    %c0_8 = arith.constant 0 : index
    %4 = vector.load %arg5[%c0_7, %c0_8] : memref<1x384xf32, #tpu.memory_space<vmem>>, vector<1x384xf32>
    %c0_9 = arith.constant 0 : index
    %c0_10 = arith.constant 0 : index
    %5 = vector.load %arg6[%c0_9, %c0_10] : memref<1x128xf32, #tpu.memory_space<vmem>>, vector<1x128xf32>
    %c0_11 = arith.constant 0 : index
    %c0_12 = arith.constant 0 : index
    %c0_13 = arith.constant 0 : index
    %6 = vector.load %arg2[%c0_11, %c0_12, %c0_13] : memref<3x128x128xf32, #tpu.memory_space<vmem>>, vector<1x128x128xf32>
    %7 = vector.shape_cast %6 : vector<1x128x128xf32> to vector<128x128xf32>
    %cst = arith.constant dense<0.000000e+00> : vector<8x128xf32>
    %8 = tpu.matmul %0, %7, %cst {dimension_numbers = #tpu.dot_dimension_numbers<[1], [0], [0], [1], [0, 0, 1, 1], [], []>} : vector<8x128xf32>, vector<128x128xf32>, vector<8x128xf32> -> vector<8x128xf32>
    %cst_14 = arith.constant dense<0.000000e+00> : vector<8x128xf32>
    %9 = tpu.matmul %1, %8, %cst_14 {dimension_numbers = #tpu.dot_dimension_numbers<[1], [0], [0], [1], [0, 0, 1, 1], [], []>} : vector<8x8xf32>, vector<8x128xf32>, vector<8x128xf32> -> vector<8x128xf32>
    %cst_15 = arith.constant dense<0.000000e+00> : vector<8x384xf32>
    %10 = tpu.matmul %9, %2, %cst_15 {dimension_numbers = #tpu.dot_dimension_numbers<[1], [0], [0], [1], [0, 0, 1, 1], [], []>} : vector<8x128xf32>, vector<128x384xf32>, vector<8x384xf32> -> vector<8x384xf32>
    %11 = vector.broadcast %4 : vector<1x384xf32> to vector<8x384xf32>
    %12 = arith.addf %10, %11 : vector<8x384xf32>
    %cst_16 = arith.constant dense<0.000000e+00> : vector<8x384xf32>
    %13 = tpu.matmul %0, %3, %cst_16 {dimension_numbers = #tpu.dot_dimension_numbers<[1], [0], [0], [1], [0, 0, 1, 1], [], []>} : vector<8x128xf32>, vector<128x384xf32>, vector<8x384xf32> -> vector<8x384xf32>
    %14 = vector.extract_strided_slice %12 {offsets = [0, 0], sizes = [8, 128], strides = [1, 1]} : vector<8x384xf32> to vector<8x128xf32>
    %15 = vector.extract_strided_slice %13 {offsets = [0, 0], sizes = [8, 128], strides = [1, 1]} : vector<8x384xf32> to vector<8x128xf32>
    %16 = arith.addf %14, %15 : vector<8x128xf32>
    %17 = arith.negf %16 : vector<8x128xf32>
    %18 = math.exp %17 : vector<8x128xf32>
    %cst_17 = arith.constant 1.000000e+00 : f32
    %19 = vector.broadcast %cst_17 : f32 to vector<8x128xf32>
    %20 = arith.addf %19, %18 : vector<8x128xf32>
    %21 = arith.divf %19, %20 : vector<8x128xf32>
    %22 = vector.extract_strided_slice %12 {offsets = [0, 128], sizes = [8, 128], strides = [1, 1]} : vector<8x384xf32> to vector<8x128xf32>
    %23 = vector.extract_strided_slice %13 {offsets = [0, 128], sizes = [8, 128], strides = [1, 1]} : vector<8x384xf32> to vector<8x128xf32>
    %24 = arith.addf %22, %23 : vector<8x128xf32>
    %25 = arith.negf %24 : vector<8x128xf32>
    %26 = math.exp %25 : vector<8x128xf32>
    %cst_18 = arith.constant 1.000000e+00 : f32
    %27 = vector.broadcast %cst_18 : f32 to vector<8x128xf32>
    %28 = arith.addf %27, %26 : vector<8x128xf32>
    %29 = arith.divf %27, %28 : vector<8x128xf32>
    %30 = vector.extract_strided_slice %12 {offsets = [0, 256], sizes = [8, 128], strides = [1, 1]} : vector<8x384xf32> to vector<8x128xf32>
    %31 = vector.extract_strided_slice %13 {offsets = [0, 256], sizes = [8, 128], strides = [1, 1]} : vector<8x384xf32> to vector<8x128xf32>
    %32 = vector.broadcast %5 : vector<1x128xf32> to vector<8x128xf32>
    %33 = arith.addf %31, %32 : vector<8x128xf32>
    %34 = arith.mulf %21, %33 : vector<8x128xf32>
    %35 = arith.addf %30, %34 : vector<8x128xf32>
    %36 = math.tanh %35 : vector<8x128xf32>
    %cst_19 = arith.constant 1.000000e+00 : f32
    %37 = vector.broadcast %cst_19 : f32 to vector<8x128xf32>
    %38 = arith.subf %37, %29 : vector<8x128xf32>
    %39 = arith.mulf %38, %36 : vector<8x128xf32>
    %40 = arith.mulf %29, %0 : vector<8x128xf32>
    %41 = arith.addf %39, %40 : vector<8x128xf32>
    %c1 = arith.constant 1 : index
    %c0_20 = arith.constant 0 : index
    %c0_21 = arith.constant 0 : index
    %42 = vector.load %arg2[%c1, %c0_20, %c0_21] : memref<3x128x128xf32, #tpu.memory_space<vmem>>, vector<1x128x128xf32>
    %43 = vector.shape_cast %42 : vector<1x128x128xf32> to vector<128x128xf32>
    %cst_22 = arith.constant dense<0.000000e+00> : vector<8x128xf32>
    %44 = tpu.matmul %41, %43, %cst_22 {dimension_numbers = #tpu.dot_dimension_numbers<[1], [0], [0], [1], [0, 0, 1, 1], [], []>} : vector<8x128xf32>, vector<128x128xf32>, vector<8x128xf32> -> vector<8x128xf32>
    %cst_23 = arith.constant dense<0.000000e+00> : vector<8x128xf32>
    %45 = tpu.matmul %1, %44, %cst_23 {dimension_numbers = #tpu.dot_dimension_numbers<[1], [0], [0], [1], [0, 0, 1, 1], [], []>} : vector<8x8xf32>, vector<8x128xf32>, vector<8x128xf32> -> vector<8x128xf32>
    %cst_24 = arith.constant dense<0.000000e+00> : vector<8x384xf32>
    %46 = tpu.matmul %45, %2, %cst_24 {dimension_numbers = #tpu.dot_dimension_numbers<[1], [0], [0], [1], [0, 0, 1, 1], [], []>} : vector<8x128xf32>, vector<128x384xf32>, vector<8x384xf32> -> vector<8x384xf32>
    %47 = vector.broadcast %4 : vector<1x384xf32> to vector<8x384xf32>
    %48 = arith.addf %46, %47 : vector<8x384xf32>
    %cst_25 = arith.constant dense<0.000000e+00> : vector<8x384xf32>
    %49 = tpu.matmul %41, %3, %cst_25 {dimension_numbers = #tpu.dot_dimension_numbers<[1], [0], [0], [1], [0, 0, 1, 1], [], []>} : vector<8x128xf32>, vector<128x384xf32>, vector<8x384xf32> -> vector<8x384xf32>
    %50 = vector.extract_strided_slice %48 {offsets = [0, 0], sizes = [8, 128], strides = [1, 1]} : vector<8x384xf32> to vector<8x128xf32>
    %51 = vector.extract_strided_slice %49 {offsets = [0, 0], sizes = [8, 128], strides = [1, 1]} : vector<8x384xf32> to vector<8x128xf32>
    %52 = arith.addf %50, %51 : vector<8x128xf32>
    %53 = arith.negf %52 : vector<8x128xf32>
    %54 = math.exp %53 : vector<8x128xf32>
    %cst_26 = arith.constant 1.000000e+00 : f32
    %55 = vector.broadcast %cst_26 : f32 to vector<8x128xf32>
    %56 = arith.addf %55, %54 : vector<8x128xf32>
    %57 = arith.divf %55, %56 : vector<8x128xf32>
    %58 = vector.extract_strided_slice %48 {offsets = [0, 128], sizes = [8, 128], strides = [1, 1]} : vector<8x384xf32> to vector<8x128xf32>
    %59 = vector.extract_strided_slice %49 {offsets = [0, 128], sizes = [8, 128], strides = [1, 1]} : vector<8x384xf32> to vector<8x128xf32>
    %60 = arith.addf %58, %59 : vector<8x128xf32>
    %61 = arith.negf %60 : vector<8x128xf32>
    %62 = math.exp %61 : vector<8x128xf32>
    %cst_27 = arith.constant 1.000000e+00 : f32
    %63 = vector.broadcast %cst_27 : f32 to vector<8x128xf32>
    %64 = arith.addf %63, %62 : vector<8x128xf32>
    %65 = arith.divf %63, %64 : vector<8x128xf32>
    %66 = vector.extract_strided_slice %48 {offsets = [0, 256], sizes = [8, 128], strides = [1, 1]} : vector<8x384xf32> to vector<8x128xf32>
    %67 = vector.extract_strided_slice %49 {offsets = [0, 256], sizes = [8, 128], strides = [1, 1]} : vector<8x384xf32> to vector<8x128xf32>
    %68 = vector.broadcast %5 : vector<1x128xf32> to vector<8x128xf32>
    %69 = arith.addf %67, %68 : vector<8x128xf32>
    %70 = arith.mulf %57, %69 : vector<8x128xf32>
    %71 = arith.addf %66, %70 : vector<8x128xf32>
    %72 = math.tanh %71 : vector<8x128xf32>
    %cst_28 = arith.constant 1.000000e+00 : f32
    %73 = vector.broadcast %cst_28 : f32 to vector<8x128xf32>
    %74 = arith.subf %73, %65 : vector<8x128xf32>
    %75 = arith.mulf %74, %72 : vector<8x128xf32>
    %76 = arith.mulf %65, %41 : vector<8x128xf32>
    %77 = arith.addf %75, %76 : vector<8x128xf32>
    %c2 = arith.constant 2 : index
    %c0_29 = arith.constant 0 : index
    %c0_30 = arith.constant 0 : index
    %78 = vector.load %arg2[%c2, %c0_29, %c0_30] : memref<3x128x128xf32, #tpu.memory_space<vmem>>, vector<1x128x128xf32>
    %79 = vector.shape_cast %78 : vector<1x128x128xf32> to vector<128x128xf32>
    %cst_31 = arith.constant dense<0.000000e+00> : vector<8x128xf32>
    %80 = tpu.matmul %77, %79, %cst_31 {dimension_numbers = #tpu.dot_dimension_numbers<[1], [0], [0], [1], [0, 0, 1, 1], [], []>} : vector<8x128xf32>, vector<128x128xf32>, vector<8x128xf32> -> vector<8x128xf32>
    %cst_32 = arith.constant dense<0.000000e+00> : vector<8x128xf32>
    %81 = tpu.matmul %1, %80, %cst_32 {dimension_numbers = #tpu.dot_dimension_numbers<[1], [0], [0], [1], [0, 0, 1, 1], [], []>} : vector<8x8xf32>, vector<8x128xf32>, vector<8x128xf32> -> vector<8x128xf32>
    %cst_33 = arith.constant dense<0.000000e+00> : vector<8x384xf32>
    %82 = tpu.matmul %81, %2, %cst_33 {dimension_numbers = #tpu.dot_dimension_numbers<[1], [0], [0], [1], [0, 0, 1, 1], [], []>} : vector<8x128xf32>, vector<128x384xf32>, vector<8x384xf32> -> vector<8x384xf32>
    %83 = vector.broadcast %4 : vector<1x384xf32> to vector<8x384xf32>
    %84 = arith.addf %82, %83 : vector<8x384xf32>
    %cst_34 = arith.constant dense<0.000000e+00> : vector<8x384xf32>
    %85 = tpu.matmul %77, %3, %cst_34 {dimension_numbers = #tpu.dot_dimension_numbers<[1], [0], [0], [1], [0, 0, 1, 1], [], []>} : vector<8x128xf32>, vector<128x384xf32>, vector<8x384xf32> -> vector<8x384xf32>
    %86 = vector.extract_strided_slice %84 {offsets = [0, 0], sizes = [8, 128], strides = [1, 1]} : vector<8x384xf32> to vector<8x128xf32>
    %87 = vector.extract_strided_slice %85 {offsets = [0, 0], sizes = [8, 128], strides = [1, 1]} : vector<8x384xf32> to vector<8x128xf32>
    %88 = arith.addf %86, %87 : vector<8x128xf32>
    %89 = arith.negf %88 : vector<8x128xf32>
    %90 = math.exp %89 : vector<8x128xf32>
    %cst_35 = arith.constant 1.000000e+00 : f32
    %91 = vector.broadcast %cst_35 : f32 to vector<8x128xf32>
    %92 = arith.addf %91, %90 : vector<8x128xf32>
    %93 = arith.divf %91, %92 : vector<8x128xf32>
    %94 = vector.extract_strided_slice %84 {offsets = [0, 128], sizes = [8, 128], strides = [1, 1]} : vector<8x384xf32> to vector<8x128xf32>
    %95 = vector.extract_strided_slice %85 {offsets = [0, 128], sizes = [8, 128], strides = [1, 1]} : vector<8x384xf32> to vector<8x128xf32>
    %96 = arith.addf %94, %95 : vector<8x128xf32>
    %97 = arith.negf %96 : vector<8x128xf32>
    %98 = math.exp %97 : vector<8x128xf32>
    %cst_36 = arith.constant 1.000000e+00 : f32
    %99 = vector.broadcast %cst_36 : f32 to vector<8x128xf32>
    %100 = arith.addf %99, %98 : vector<8x128xf32>
    %101 = arith.divf %99, %100 : vector<8x128xf32>
    %102 = vector.extract_strided_slice %84 {offsets = [0, 256], sizes = [8, 128], strides = [1, 1]} : vector<8x384xf32> to vector<8x128xf32>
    %103 = vector.extract_strided_slice %85 {offsets = [0, 256], sizes = [8, 128], strides = [1, 1]} : vector<8x384xf32> to vector<8x128xf32>
    %104 = vector.broadcast %5 : vector<1x128xf32> to vector<8x128xf32>
    %105 = arith.addf %103, %104 : vector<8x128xf32>
    %106 = arith.mulf %93, %105 : vector<8x128xf32>
    %107 = arith.addf %102, %106 : vector<8x128xf32>
    %108 = math.tanh %107 : vector<8x128xf32>
    %cst_37 = arith.constant 1.000000e+00 : f32
    %109 = vector.broadcast %cst_37 : f32 to vector<8x128xf32>
    %110 = arith.subf %109, %101 : vector<8x128xf32>
    %111 = arith.mulf %110, %108 : vector<8x128xf32>
    %112 = arith.mulf %101, %77 : vector<8x128xf32>
    %113 = arith.addf %111, %112 : vector<8x128xf32>
    %cst_38 = arith.constant 0.000000e+00 : f32
    %114 = vector.broadcast %cst_38 : f32 to vector<8x128xf32>
    %115 = arith.maximumf %113, %114 : vector<8x128xf32>
    %c0_39 = arith.constant 0 : index
    %c0_40 = arith.constant 0 : index
    %116 = vector.load %arg7[%c0_39, %c0_40] : memref<128x128xf32, #tpu.memory_space<vmem>>, vector<128x128xf32>
    %cst_41 = arith.constant dense<0.000000e+00> : vector<8x128xf32>
    %117 = tpu.matmul %115, %116, %cst_41 {dimension_numbers = #tpu.dot_dimension_numbers<[1], [0], [0], [1], [0, 0, 1, 1], [], []>} : vector<8x128xf32>, vector<128x128xf32>, vector<8x128xf32> -> vector<8x128xf32>
    %c0_42 = arith.constant 0 : index
    %c0_43 = arith.constant 0 : index
    %118 = vector.load %arg8[%c0_42, %c0_43] : memref<1x128xf32, #tpu.memory_space<vmem>>, vector<1x128xf32>
    %119 = vector.broadcast %118 : vector<1x128xf32> to vector<8x128xf32>
    %120 = arith.addf %117, %119 : vector<8x128xf32>
    %c0_44 = arith.constant 0 : index
    %c0_45 = arith.constant 0 : index
    %121 = vector.load %arg9[%c0_44, %c0_45] : memref<8x128xf32, #tpu.memory_space<vmem>>, vector<8x128xf32>
    tpu.vector_store %arg9[%c0_44, %c0_45], %120 {strides = array<i32>} : memref<8x128xf32, #tpu.memory_space<vmem>>, vector<8x128xf32>,
    return
  }
}

</mosaic_0001>

<bundles_post_ra>
// kernel: tpu_custom_call.1
= control target key start
LH: loop header
LB: loop body
LE: loop exit
PB: predicated region body
PF: predicated region fallthrough
CT: control target
= control target key end

     0   :  { %14 = vsyncpa [#allocation3], 0  ;;  %s3527_s0 = inlined_call_operand.hbm [shape: f32[8,128], index: 0, kind: input, shape index: {}]   ;;  %s3528_s1 = inlined_call_operand.hbm [shape: f32[8,8], index: 1, kind: input, shape index: {}]   ;;  %s3529_s2 = inlined_call_operand.hbm [shape: f32[3,128,128], index: 2, kind: input, shape index: {}]   ;;  %s3530_s3 = inlined_call_operand.hbm [shape: f32[128,384], index: 3, kind: input, shape index: {}]   ;;  %s3531_s4 = inlined_call_operand.hbm [shape: f32[128,384], index: 4, kind: input, shape index: {}]   ;;  %s3532_s5 = inlined_call_operand.vmem [shape: f32[1,384], index: 5, kind: input, shape index: {}]   ;;  %s3533_s6 = inlined_call_operand.vmem [shape: f32[1,128], index: 6, kind: input, shape index: {}]   ;;  %s3534_s7 = inlined_call_operand.hbm [shape: f32[128,128], index: 7, kind: input, shape index: {}]   ;;  %s3535_s8 = inlined_call_operand.vmem [shape: f32[1,128], index: 8, kind: input, shape index: {}]   ;;  %s3536_s9 = inlined_call_operand.hbm [shape: f32[8,128], index: 9, kind: output, shape index: {}]  }
   0x1   :  { %15 = vsyncpa [#allocation6], 0 }
   0x2   :  { %16 = vsyncpa [#allocation9], 0 }
   0x3   :  { %17 = vsyncpa [#allocation12], 0 }
   0x4   :  { %18 = vsyncpa [#allocation4], 0  ;;  %s2936_s30 = smov [#allocation5]   ;;  %s2937_s11 = smov [#allocation8]  }
   0x5   :  { %s35_s10 = sshll.u32 %s2936_s30, 4  ;;  %s56_s12 = sshll.u32 %s2937_s11, 4  ;;  %s36_s10 = int_to_ptr.vmem [resolvable:$true] %s35_s10  ;;  %s3000_s12 = int_to_ptr.vmem [resolvable:$true] %s56_s12 }
   0x6   :  { %s2772_s15 = scalar_lea.hbm %s3528_s1, 128 }
   0x7   :  { %p2773_p0 = scmp.ne.s32.totalorder %s3528_s1, %s2772_s15  ;;  %p2776_p1 = scmp.lt.u32.totalorder %s2772_s15, %s3528_s1 }
   0x9   :  { %p2778_p2 = pnand %p2776_p1, %p2773_p0 }
   0xb   :  { %2781 = shalt.err (!%p2778_p2)
}
   0xc   :  { %s2782_s20 = scalar_lea.vmem %s36_s10, 128  ;;  %p2787_p4 = scmp.lt.s32.totalorder %s36_s10, %s36_s10 }
   0xd   :  { %p2783_p3 = scmp.ne.s32.totalorder %s36_s10, %s2782_s20  ;;  %p2788_p5 = scmp.lt.s32.totalorder %s2782_s20, %s2782_s20 }
   0xf   :  { %p2789_p6 = por %p2788_p5, %p2787_p4 }
  0x11   :  { %p2790_p7 = pnand %p2789_p6, %p2783_p3 }
  0x13   :  { %2793 = shalt.err (!%p2790_p7)
}
  0x14   :  { %38 = dma.hbm_to_vmem [thread:$0]  %s3528_s1, 128, %s36_s10, [#allocation6]  }
  0x15   :  { %s2794_s25 = scalar_lea.hbm %s3530_s3, 6144 }
  0x16   :  { %p2795_p8 = scmp.ne.s32.totalorder %s3530_s3, %s2794_s25  ;;  %p2798_p9 = scmp.lt.u32.totalorder %s2794_s25, %s3530_s3 }
  0x18   :  { %p2800_p10 = pnand %p2798_p9, %p2795_p8 }
  0x1a   :  { %2803 = shalt.err (!%p2800_p10)
}
  0x1b   :  { %s2804_s30 = scalar_lea.vmem %s3000_s12, 6144  ;;  %p2809_p12 = scmp.lt.s32.totalorder %s3000_s12, %s3000_s12 }
  0x1c   :  { %p2805_p11 = scmp.ne.s32.totalorder %s3000_s12, %s2804_s30  ;;  %p2810_p13 = scmp.lt.s32.totalorder %s2804_s30, %s2804_s30 }
  0x1e   :  { %p2811_p0 = por %p2810_p13, %p2809_p12 }
  0x20   :  { %p2812_p1 = pnand %p2811_p0, %p2805_p11 }
  0x22   :  { %2815 = shalt.err (!%p2812_p1)
}
  0x23   :  { %s2938_s1 = smov 384   ;;  %s2939_s10 = smov 24  }
  0x24   :  { %62 = dma.hbm_to_vmem [thread:$0]  %s3530_s3, 6144, %s3000_s12, [#allocation9], %s2938_s1, %s2938_s1, %s2939_s10  }
  0x25   :  { %s2940_s14 = smov [#allocation2]   ;;  %s2941_s16 = smov [#allocation7]  }
  0x26   :  { %s25_s15 = sshll.u32 %s2940_s14, 4  ;;  %s44_s17 = sshll.u32 %s2941_s16, 4  ;;  %s26_s15 = int_to_ptr.vmem [resolvable:$true] %s25_s15  ;;  %s3034_s17 = int_to_ptr.vmem [resolvable:$true] %s44_s17 }
  0x27   :  { %s2816_s20 = scalar_lea.hbm %s3527_s0, 128 }
  0x28   :  { %p2817_p2 = scmp.ne.s32.totalorder %s3527_s0, %s2816_s20  ;;  %p2820_p3 = scmp.lt.u32.totalorder %s2816_s20, %s3527_s0 }
  0x2a   :  { %p2822_p4 = pnand %p2820_p3, %p2817_p2 }
  0x2c   :  { %2825 = shalt.err (!%p2822_p4)
}
  0x2d   :  { %s2826_s3 = scalar_lea.vmem %s26_s15, 128  ;;  %p2831_p6 = scmp.lt.s32.totalorder %s26_s15, %s26_s15 }
  0x2e   :  { %p2827_p5 = scmp.ne.s32.totalorder %s26_s15, %s2826_s3  ;;  %p2832_p7 = scmp.lt.s32.totalorder %s2826_s3, %s2826_s3 }
  0x30   :  { %p2833_p8 = por %p2832_p7, %p2831_p6 }
  0x32   :  { %p2834_p9 = pnand %p2833_p8, %p2827_p5 }
  0x34   :  { %2837 = shalt.err (!%p2834_p9)
}
  0x35   :  { %28 = dma.hbm_to_vmem [thread:$0]  %s3527_s0, 128, %s26_s15, [#allocation3]  }
  0x36   :  { %s2838_s28 = scalar_lea.hbm %s3529_s2, 6144 }
  0x37   :  { %p2839_p10 = scmp.ne.s32.totalorder %s3529_s2, %s2838_s28  ;;  %p2842_p11 = scmp.lt.u32.totalorder %s2838_s28, %s3529_s2 }
  0x39   :  { %p2844_p12 = pnand %p2842_p11, %p2839_p10 }
  0x3b   :  { %2847 = shalt.err (!%p2844_p12)
}
  0x3c   :  { %s2848_s14 = scalar_lea.vmem %s3034_s17, 6144  ;;  %p2853_p0 = scmp.lt.s32.totalorder %s3034_s17, %s3034_s17 }
  0x3d   :  { %p2849_p13 = scmp.ne.s32.totalorder %s3034_s17, %s2848_s14  ;;  %p2854_p1 = scmp.lt.s32.totalorder %s2848_s14, %s2848_s14 }
  0x3f   :  { %p2855_p2 = por %p2854_p1, %p2853_p0 }
  0x41   :  { %p2856_p3 = pnand %p2855_p2, %p2849_p13 }
  0x43   :  { %2859 = shalt.err (!%p2856_p3)
}
  0x44   :  { %s2942_s0 = smov 128   ;;  %s2943_s15 = smov 8  }
  0x45   :  { %50 = dma.hbm_to_vmem [thread:$0]  %s3529_s2, 6144, %s3034_s17, [#allocation6], %s2942_s0, %s2942_s0, %s2943_s15  }
  0x46   :  { %s2944_s19 = smov [#allocation10]   ;;  %s2945_s21 = smov [#allocation11]  }
  0x47   :  { %s68_s20 = sshll.u32 %s2944_s19, 4  ;;  %s84_s22 = sshll.u32 %s2945_s21, 4  ;;  %s69_s20 = int_to_ptr.vmem [resolvable:$true] %s68_s20  ;;  %s3068_s22 = int_to_ptr.vmem [resolvable:$true] %s84_s22 }
  0x48   :  { %s2860_s3 = scalar_lea.hbm %s3531_s4, 6144 }
  0x49   :  { %p2861_p4 = scmp.ne.s32.totalorder %s3531_s4, %s2860_s3  ;;  %p2864_p5 = scmp.lt.u32.totalorder %s2860_s3, %s3531_s4 }
  0x4b   :  { %p2866_p6 = pnand %p2864_p5, %p2861_p4 }
  0x4d   :  { %2869 = shalt.err (!%p2866_p6)
}
  0x4e   :  { %s2870_s2 = scalar_lea.vmem %s69_s20, 6144  ;;  %p2875_p8 = scmp.lt.s32.totalorder %s69_s20, %s69_s20 }
  0x4f   :  { %p2871_p7 = scmp.ne.s32.totalorder %s69_s20, %s2870_s2  ;;  %p2876_p9 = scmp.lt.s32.totalorder %s2870_s2, %s2870_s2 }
  0x51   :  { %p2877_p10 = por %p2876_p9, %p2875_p8 }
  0x53   :  { %p2878_p11 = pnand %p2877_p10, %p2871_p7 }
  0x55   :  { %2881 = shalt.err (!%p2878_p11)
}
  0x56   :  { %74 = dma.hbm_to_vmem [thread:$0]  %s3531_s4, 6144, %s69_s20, [#allocation9], %s2938_s1, %s2938_s1, %s2939_s10  }
  0x57   :  { %s2882_s11 = scalar_lea.hbm %s3534_s7, 2048 }
  0x58   :  { %p2883_p12 = scmp.ne.s32.totalorder %s3534_s7, %s2882_s11  ;;  %p2886_p13 = scmp.lt.u32.totalorder %s2882_s11, %s3534_s7 }
  0x5a   :  { %p2888_p0 = pnand %p2886_p13, %p2883_p12 }
  0x5c   :  { %2891 = shalt.err (!%p2888_p0)
}
  0x5d   :  { %s2892_s19 = scalar_lea.vmem %s3068_s22, 2048  ;;  %p2897_p2 = scmp.lt.s32.totalorder %s3068_s22, %s3068_s22 }
  0x5e   :  { %p2893_p1 = scmp.ne.s32.totalorder %s3068_s22, %s2892_s19  ;;  %p2898_p3 = scmp.lt.s32.totalorder %s2892_s19, %s2892_s19 }
  0x60   :  { %p2899_p4 = por %p2898_p3, %p2897_p2 }
  0x62   :  { %p2900_p5 = pnand %p2899_p4, %p2893_p1 }
  0x64   :  { %2903 = shalt.err (!%p2900_p5)
}
  0x65   :  { %90 = dma.hbm_to_vmem [thread:$0]  %s3534_s7, 2048, %s3068_s22, [#allocation12], %s2942_s0, %s2942_s0, %s2943_s15  }
  0x66   :  { %2926 = dma.done.wait [#allocation3], 128  }
  0x67   :  { %2927 = vsyncadd [#allocation3], 4294967168 }
  0x68   :  { %2928 = dma.done.wait [#allocation6], 6272  }
  0x69   :  { %2929 = vsyncadd [#allocation6], 4294961024 }
  0x6a   :  { %2930 = dma.done.wait [#allocation9], 12288  }
  0x6b   :  { %2931 = vsyncadd [#allocation9], 4294955008 }
  0x6c   :  { %2932 = dma.done.wait [#allocation12], 2048  }
  0x6d   :  { %2933 = vsyncadd [#allocation12], 4294965248  ;;  %v3540_v0 = vmov 0.0|0.0   ;;  %vm2947_vm0 = vmmov 0   ;;  %v3537_v1 = vmov 0.0   ;;  %v211_v2 = vld [vmem:[#allocation7] sm:$0xff] }
  0x6e   :  { %2284 = vmatprep.subr.bf16.mxu0 %v3540_v0  ;;  %1951 = vmatprep.mubr.msk.f32.mxu0 %vm2947_vm0, %v3537_v1  ;;  %v212_v3 = vld [vmem:[#allocation7 + $0x8] sm:$0xff]  ;;  %v213_v4 = vld [vmem:[#allocation7 + $0x10] sm:$0xff]  ;;  %v214_v6 = vld [vmem:[#allocation7 + $0x18] sm:$0xff]  ;;  %vm297_vm1 = vcmask 64512   ;;  %s2949_s20 = smov [#allocation13]  }
  0x6f   :  { %1954 = vmatprep.subr.mxu1 %v3537_v1  ;;  %1956 = vmatprep.mubr.msk.f32.mxu1 %vm2947_vm0, %v3537_v1  ;;  %v2285_v5 = vpack.c.bf16 %v212_v3, %v211_v2  ;;  %v2288_v7 = vpack.c.bf16 %v214_v6, %v213_v4  ;;  %v215_v8 = vld [vmem:[#allocation7 + $0x20] sm:$0xff]  ;;  %v216_v9 = vld [vmem:[#allocation7 + $0x28] sm:$0xff]  ;;  %v217_v11 = vld [vmem:[#allocation7 + $0x30] sm:$0xff]  ;;  %s1720_s21 = sshll.u32 %s2949_s20, 4  ;;  %s1721_s21 = int_to_ptr.vmem [resolvable:$true] %s1720_s21 }
  0x70   :  { %v2291_v10 = vpack.c.bf16 %v216_v9, %v215_v8  ;;  %v218_v12 = vld [vmem:[#allocation7 + $0x38] sm:$0xff]  ;;  %v219_v14 = vld [vmem:[#allocation7 + $0x40] sm:$0xff]  ;;  %v220_v15 = vld [vmem:[#allocation7 + $0x48] sm:$0xff]  ;;  %s2904_s22 = scalar_lea.vmem %s1721_s21, 128  ;;  %p2909_p7 = scmp.lt.s32.totalorder %s1721_s21, %s1721_s21 }
  0x71   :  { %2286 = vmatpush3.bf16.msra.mxu0 %v2285_v5  ;;  %v2294_v13 = vpack.c.bf16 %v218_v12, %v217_v11  ;;  %v2297_v16 = vpack.c.bf16 %v220_v15, %v219_v14  ;;  %v221_v17 = vld [vmem:[#allocation7 + $0x50] sm:$0xff]  ;;  %v222_v18 = vld [vmem:[#allocation7 + $0x58] sm:$0xff]  ;;  %v223_v20 = vld [vmem:[#allocation7 + $0x60] sm:$0xff]  ;;  %p2905_p6 = scmp.ne.s32.totalorder %s1721_s21, %s2904_s22  ;;  %p2910_p8 = scmp.lt.s32.totalorder %s2904_s22, %s2904_s22 }
  0x72   :  { %2287 = vmatprep.subr.bf16.mxu0 %v3540_v0  ;;  %v2300_v19 = vpack.c.bf16 %v222_v18, %v221_v17  ;;  %v224_v21 = vld [vmem:[#allocation7 + $0x68] sm:$0xff]  ;;  %v225_v23 = vld [vmem:[#allocation7 + $0x70] sm:$0xff]  ;;  %v226_v24 = vld [vmem:[#allocation7 + $0x78] sm:$0xff] }
  0x73   :  { %v2303_v22 = vpack.c.bf16 %v224_v21, %v223_v20  ;;  %v2306_v25 = vpack.c.bf16 %v226_v24, %v225_v23  ;;  %v3118_v26 = vld [vmem:[#allocation2] sm:$0xff]  ;;  %v118_v28 = vld [vmem:[#allocation8 + $0x28] sm:$0xff]  ;;  %v121_v30 = vld [vmem:[#allocation8 + $0x40] sm:$0xff]  ;;  %p2911_p9 = por %p2910_p8, %p2909_p7 }
  0x74   :  { %v115_v27 = vld [vmem:[#allocation8 + $0x10] sm:$0xff]  ;;  %v124_v31 = vld [vmem:[#allocation8 + $0x58] sm:$0xff]  ;;  %v130_v34 = vld [vmem:[#allocation8 + $0x88] sm:$0xff] }
  0x75   :  { %2289 = vmatpush3.bf16.msra.mxu0 %v2288_v7  ;;  %v3124_v29 = vpack.c.bf16 %v118_v28, %v115_v27  ;;  %v3128_v32 = vpack.c.bf16 %v124_v31, %v121_v30  ;;  %v127_v33 = vld [vmem:[#allocation8 + $0x70] sm:$0xff]  ;;  %v133_v36 = vld [vmem:[#allocation8 + $0xa0] sm:$0xff]  ;;  %v136_v37 = vld [vmem:[#allocation8 + $0xb8] sm:$0xff]  ;;  %p2912_p10 = pnand %p2911_p9, %p2905_p6 }
  0x76   :  { %2290 = vmatprep.subr.bf16.mxu0 %v3540_v0  ;;  %v3132_v35 = vpack.c.bf16 %v130_v34, %v127_v33  ;;  %v3136_v38 = vpack.c.bf16 %v136_v37, %v133_v36  ;;  %v139_v39 = vld [vmem:[#allocation8 + $0xd0] sm:$0xff]  ;;  %v142_v40 = vld [vmem:[#allocation8 + $0xe8] sm:$0xff]  ;;  %v145_v42 = vld [vmem:[#allocation8 + $0x100] sm:$0xff] }
  0x77   :  { %3550 = vst [vmem:[#allocation19_spill] sm:$0xff] %v3124_v29  ;;  %3551 = vst [vmem:[#allocation20_spill] sm:$0xff] %v3128_v32  ;;  %v3140_v41 = vpack.c.bf16 %v142_v40, %v139_v39  ;;  %v148_v43 = vld [vmem:[#allocation8 + $0x118] sm:$0xff]  ;;  %v151_v45 = vld [vmem:[#allocation8 + $0x130] sm:$0xff] }
  0x78   :  { %3552 = vst [vmem:[#allocation21_spill] sm:$0xff] %v3132_v35  ;;  %3553 = vst [vmem:[#allocation22_spill] sm:$0xff] %v3136_v38  ;;  %v3144_v44 = vpack.c.bf16 %v148_v43, %v145_v42  ;;  %v154_v46 = vld [vmem:[#allocation8 + $0x148] sm:$0xff]  ;;  %v157_v48 = vld [vmem:[#allocation8 + $0x160] sm:$0xff] }
  0x79   :  { %2292 = vmatpush3.bf16.msra.mxu0 %v2291_v10  ;;  %3554 = vst [vmem:[#allocation23_spill] sm:$0xff] %v3140_v41  ;;  %v3148_v47 = vpack.c.bf16 %v154_v46, %v151_v45  ;;  %v160_v49 = vld [vmem:[#allocation8 + $0x178] sm:$0xff]  ;;  %v114_v51 = vld [vmem:[#allocation8 + $0x8] sm:$0xff]  ;;  %v117_v52 = vld [vmem:[#allocation8 + $0x20] sm:$0xff] }
  0x7a   :  { %2293 = vmatprep.subr.bf16.mxu0 %v3540_v0  ;;  %3555 = vst [vmem:[#allocation24_spill] sm:$0xff] %v3144_v44  ;;  %v3152_v50 = vpack.c.bf16 %v160_v49, %v157_v48  ;;  %v113_v53 = vld [vmem:[#allocation8] sm:$0xff]  ;;  %v116_v54 = vld [vmem:[#allocation8 + $0x18] sm:$0xff]  ;;  %v123_v56 = vld [vmem:[#allocation8 + $0x50] sm:$0xff]  ;;  %v3156_v57 = vpack.c.bf16 %v117_v52, %v114_v51 }
  0x7b   :  { %3556 = vst [vmem:[#allocation25_spill] sm:$0xff] %v3148_v47  ;;  %v120_v55 = vld [vmem:[#allocation8 + $0x38] sm:$0xff]  ;;  %v3160_v59 = vpack.c.bf16 %v116_v54, %v113_v53  ;;  %v119_v62 = vld [vmem:[#allocation8 + $0x30] sm:$0xff]  ;;  %v122_v63 = vld [vmem:[#allocation8 + $0x48] sm:$0xff] }
  0x7c   :  { %3557 = vst [vmem:[#allocation26_spill] sm:$0xff] %v3152_v50  ;;  %v3158_v58 = vld [vmem:[#allocation5] sm:$0xff]  ;;  %v3162_v61 = vpack.c.bf16 %v123_v56, %v120_v55  ;;  %v126_v3 = vld [vmem:[#allocation8 + $0x68] sm:$0xff]  ;;  %v129_v4 = vld [vmem:[#allocation8 + $0x80] sm:$0xff]  ;;  %v3168_v5 = vpack.c.bf16 %v122_v63, %v119_v62 }
  0x7d   :  { %2295 = vmatpush3.bf16.msra.mxu0 %v2294_v13  ;;  %v3172_v6 = vpack.c.bf16 %v129_v4, %v126_v3  ;;  %v125_v7 = vld [vmem:[#allocation8 + $0x60] sm:$0xff]  ;;  %v128_v8 = vld [vmem:[#allocation8 + $0x78] sm:$0xff]  ;;  %v135_v10 = vld [vmem:[#allocation8 + $0xb0] sm:$0xff] }
  0x7e   :  { %2296 = vmatprep.subr.bf16.mxu0 %v3540_v0  ;;  %v132_v9 = vld [vmem:[#allocation8 + $0x98] sm:$0xff]  ;;  %v3175_v11 = vpack.c.bf16 %v128_v8, %v125_v7  ;;  %v131_v13 = vld [vmem:[#allocation8 + $0x90] sm:$0xff]  ;;  %v134_v14 = vld [vmem:[#allocation8 + $0xa8] sm:$0xff] }
  0x7f   :  { %v3178_v12 = vpack.c.bf16 %v135_v10, %v132_v9  ;;  %v138_v15 = vld [vmem:[#allocation8 + $0xc8] sm:$0xff]  ;;  %v3181_v17 = vpack.c.bf16 %v134_v14, %v131_v13  ;;  %v140_v20 = vld [vmem:[#allocation8 + $0xd8] sm:$0xff]  ;;  %v153_v30 = vld [vmem:[#allocation8 + $0x140] sm:$0xff] }
  0x80   :  { %v144_v21 = vld [vmem:[#allocation8 + $0xf8] sm:$0xff]  ;;  %v146_v27 = vld [vmem:[#allocation8 + $0x108] sm:$0xff]  ;;  %v149_v34 = vld [vmem:[#allocation8 + $0x120] sm:$0xff] }
  0x81   :  { %2298 = vmatpush3.bf16.msra.mxu0 %v2297_v16  ;;  %v141_v16 = vld [vmem:[#allocation8 + $0xe0] sm:$0xff]  ;;  %v150_v28 = vld [vmem:[#allocation8 + $0x128] sm:$0xff]  ;;  %v152_v36 = vld [vmem:[#allocation8 + $0x138] sm:$0xff] }
  0x82   :  { %2299 = vmatprep.subr.bf16.mxu0 %v3540_v0  ;;  %v3184_v18 = vpack.c.bf16 %v141_v16, %v138_v15  ;;  %v3196_v33 = vpack.c.bf16 %v153_v30, %v150_v28  ;;  %v156_v37 = vld [vmem:[#allocation8 + $0x158] sm:$0xff]  ;;  %v159_v39 = vld [vmem:[#allocation8 + $0x170] sm:$0xff]  ;;  %v3199_v40 = vpack.c.bf16 %v152_v36, %v149_v34  ;;  %v158_v45 = vld [vmem:[#allocation8 + $0x168] sm:$0xff] }
  0x83   :  { %v3202_v42 = vpack.c.bf16 %v159_v39, %v156_v37  ;;  %v155_v43 = vld [vmem:[#allocation8 + $0x150] sm:$0xff]  ;;  %v162_v48 = vld [vmem:[#allocation10 + $0x8] sm:$0xff]  ;;  %v165_v49 = vld [vmem:[#allocation10 + $0x20] sm:$0xff] }
  0x84   :  { %v3205_v46 = vpack.c.bf16 %v158_v45, %v155_v43  ;;  %v3209_v51 = vpack.c.bf16 %v165_v49, %v162_v48  ;;  %v161_v52 = vld [vmem:[#allocation10] sm:$0xff]  ;;  %v164_v53 = vld [vmem:[#allocation10 + $0x18] sm:$0xff]  ;;  %v163_v54 = vld [vmem:[#allocation10 + $0x10] sm:$0xff] }
  0x85   :  { %2301 = vmatpush3.bf16.msra.mxu0 %v2300_v19  ;;  %v137_v19 = vld [vmem:[#allocation8 + $0xc0] sm:$0xff]  ;;  %v166_v55 = vld [vmem:[#allocation10 + $0x28] sm:$0xff]  ;;  %v168_v56 = vld [vmem:[#allocation10 + $0x38] sm:$0xff]  ;;  %v3212_v62 = vpack.c.bf16 %v164_v53, %v161_v52 }
  0x86   :  { %2302 = vmatprep.subr.bf16.mxu0 %v3540_v0  ;;  %v3187_v23 = vpack.c.bf16 %v140_v20, %v137_v19  ;;  %v167_v63 = vld [vmem:[#allocation10 + $0x30] sm:$0xff]  ;;  %v170_v4 = vld [vmem:[#allocation10 + $0x48] sm:$0xff]  ;;  %v169_v7 = vld [vmem:[#allocation10 + $0x40] sm:$0xff] }
  0x87   :  { %v172_v8 = vld [vmem:[#allocation10 + $0x58] sm:$0xff]  ;;  %v174_v10 = vld [vmem:[#allocation10 + $0x68] sm:$0xff]  ;;  %v177_v13 = vld [vmem:[#allocation10 + $0x80] sm:$0xff]  ;;  %v3219_v15 = vpack.c.bf16 %v170_v4, %v167_v63 }
  0x88   :  { %v173_v16 = vld [vmem:[#allocation10 + $0x60] sm:$0xff]  ;;  %v3222_v19 = vpack.c.bf16 %v172_v8, %v169_v7  ;;  %v3225_v20 = vpack.c.bf16 %v177_v13, %v174_v10  ;;  %v183_v28 = vld [vmem:[#allocation10 + $0xb0] sm:$0xff]  ;;  %v182_v39 = vld [vmem:[#allocation10 + $0xa8] sm:$0xff] }
  0x89   :  { %2304 = vmatpush3.bf16.msra.mxu0 %v2303_v22  ;;  %v147_v22 = vld [vmem:[#allocation8 + $0x110] sm:$0xff]  ;;  %v181_v43 = vld [vmem:[#allocation10 + $0xa0] sm:$0xff]  ;;  %v184_v45 = vld [vmem:[#allocation10 + $0xb8] sm:$0xff] }
  0x8a   :  { %2305 = vmatprep.subr.bf16.mxu0 %v3540_v0  ;;  %v3190_v24 = vpack.c.bf16 %v147_v22, %v144_v21  ;;  %v176_v21 = vld [vmem:[#allocation10 + $0x78] sm:$0xff]  ;;  %v175_v22 = vld [vmem:[#allocation10 + $0x70] sm:$0xff]  ;;  %v186_v48 = vld [vmem:[#allocation10 + $0xc8] sm:$0xff] }
  0x8b   :  { %v3232_v30 = vpack.c.bf16 %v176_v21, %v173_v16  ;;  %v179_v34 = vld [vmem:[#allocation10 + $0x90] sm:$0xff]  ;;  %v189_v49 = vld [vmem:[#allocation10 + $0xe0] sm:$0xff]  ;;  %v190_v63 = vld [vmem:[#allocation10 + $0xe8] sm:$0xff] }
  0x8c   :  { %v3242_v52 = vpack.c.bf16 %v182_v39, %v179_v34  ;;  %v185_v53 = vld [vmem:[#allocation10 + $0xc0] sm:$0xff]  ;;  %v192_v4 = vld [vmem:[#allocation10 + $0xf8] sm:$0xff]  ;;  %v195_v7 = vld [vmem:[#allocation10 + $0x110] sm:$0xff] }
  0x8d   :  { %2307 = vmatpush3.bf16.msra.mxu0 %v2306_v25  ;;  %v143_v25 = vld [vmem:[#allocation8 + $0xf0] sm:$0xff]  ;;  %v3258_v13 = vpack.c.bf16 %v195_v7, %v192_v4  ;;  %v193_v16 = vld [vmem:[#allocation10 + $0x100] sm:$0xff]  ;;  %v196_v21 = vld [vmem:[#allocation10 + $0x118] sm:$0xff] }
  0x8e   :  { %2340 = vmatprep.subr.bf16.mxu0 %v3540_v0  ;;  %v3193_v31 = vpack.c.bf16 %v146_v27, %v143_v25  ;;  %v178_v25 = vld [vmem:[#allocation10 + $0x88] sm:$0xff]  ;;  %v180_v27 = vld [vmem:[#allocation10 + $0x98] sm:$0xff]  ;;  %v3265_v34 = vpack.c.bf16 %v196_v21, %v193_v16 }
  0x8f   :  { %v3235_v36 = vpack.c.bf16 %v178_v25, %v175_v22  ;;  %v3238_v37 = vpack.c.bf16 %v183_v28, %v180_v27  ;;  %v198_v22 = vld [vmem:[#allocation10 + $0x128] sm:$0xff]  ;;  %v201_v25 = vld [vmem:[#allocation10 + $0x140] sm:$0xff] }
  0x90   :  { %1952 = vmatmul.mubr.f32.vlgmr.msra.gmra.mrb[0].mxu0 %v3118_v26  ;;  %v197_v28 = vld [vmem:[#allocation10 + $0x120] sm:$0xff]  ;;  %v3268_v39 = vpack.c.bf16 %v201_v25, %v198_v22  ;;  %v206_v7 = vld [vmem:[#allocation10 + $0x168] sm:$0xff] }
  0x91   :  { %1991 = vmatprep.mubr.msk.f32.mxu0 %vm2947_vm0, %v3537_v1  ;;  %2342 = vmatpush3.bf16.msra.mxu0 %v3124_v29  ;;  %v698_v22 = vld [vmem:[#allocation7 + $0x80] sm:$0xff]  ;;  %v699_v25 = vld [vmem:[#allocation7 + $0x88] sm:$0xff] }
  0x92   :  { %2343 = vmatprep.subr.bf16.mxu0 %v3540_v0 }
  0x95   :  { %2345 = vmatpush3.bf16.msra.mxu0 %v3128_v32 }
  0x96   :  { %2346 = vmatprep.subr.bf16.mxu0 %v3540_v0 }
  0x99   :  { %2348 = vmatpush3.bf16.msra.mxu0 %v3132_v35 }
  0x9a   :  { %2349 = vmatprep.subr.bf16.mxu0 %v3540_v0 }
  0x9d   :  { %2351 = vmatpush3.bf16.msra.mxu0 %v3136_v38 }
  0x9e   :  { %2352 = vmatprep.subr.bf16.mxu0 %v3540_v0 }
  0xa1   :  { %2354 = vmatpush3.bf16.msra.mxu0 %v3140_v41 }
  0xa2   :  { %2355 = vmatprep.subr.bf16.mxu0 %v3540_v0 }
  0xa5   :  { %2357 = vmatpush3.bf16.msra.mxu0 %v3144_v44 }
  0xa6   :  { %2358 = vmatprep.subr.bf16.mxu0 %v3540_v0 }
  0xa9   :  { %2360 = vmatpush3.bf16.msra.mxu0 %v3148_v47 }
  0xaa   :  { %2361 = vmatprep.subr.bf16.mxu0 %v3540_v0 }
  0xad   :  { %2363 = vmatpush3.bf16.msra.mxu0 %v3152_v50 }
  0xae   :  { %2396 = vmatprep.subr.bf16.mxu0 %v3540_v0 }
 0x163   :  { %v293_v60 = vpop.f32.mrb[0].mxu0 }
 0x164   :  { %v1953_v2 = vpop.f32.mrb[1].mxu0  ;;  %1955 = vmatpush3.msra.mxu1 %v293_v60  ;;  %v171_v60 = vld [vmem:[#allocation10 + $0x50] sm:$0xff] }
 0x165   :  { %1957 = vmatmul.mubr.msk.f32.vlgmr.msra.gmra.mrb[0].mxu1 %vm297_vm1, %v3158_v58  ;;  %2309 = vmatprep.subr.bf16.mxu1 %v3156_v57  ;;  %v3214_v2 = vpack.c.bf16 %v166_v55, %v163_v54  ;;  %v3216_v3 = vpack.c.bf16 %v171_v60, %v168_v56  ;;  %v3245_v54 = vpack.c.bf16 %v184_v45, %v181_v43  ;;  %v188_v56 = vld [vmem:[#allocation10 + $0xd8] sm:$0xff]  ;;  %v187_v60 = vld [vmem:[#allocation10 + $0xd0] sm:$0xff] }
 0x166   :  { %2311 = vmatpush1.bf16.msra.mxu1 %v3160_v59  ;;  %451 = vmatprep.mubr.f32.mxu1 %v3537_v1  ;;  %v3248_v55 = vpack.c.bf16 %v189_v49, %v186_v48  ;;  %v3252_v8 = vpack.c.bf16 %v188_v56, %v185_v53  ;;  %v3255_v10 = vpack.c.bf16 %v190_v63, %v187_v60  ;;  %v200_v43 = vld [vmem:[#allocation10 + $0x138] sm:$0xff]  ;;  %v199_v45 = vld [vmem:[#allocation10 + $0x130] sm:$0xff]  ;;  %v202_v48 = vld [vmem:[#allocation10 + $0x148] sm:$0xff] }
 0x167   :  { %2313 = vmatprep.subr.bf16.mxu1 %v3162_v61  ;;  %v204_v49 = vld [vmem:[#allocation10 + $0x158] sm:$0xff]  ;;  %v207_v53 = vld [vmem:[#allocation10 + $0x170] sm:$0xff]  ;;  %v3272_v56 = vpack.c.bf16 %v200_v43, %v197_v28  ;;  %v3275_v63 = vpack.c.bf16 %v202_v48, %v199_v45  ;;  %v2421_v28 = vpack.c.bf16 %v699_v25, %v698_v22  ;;  %v706_v22 = vld [vmem:[#allocation7 + $0xc0] sm:$0xff] }
 0x168   :  { %v203_v60 = vld [vmem:[#allocation10 + $0x150] sm:$0xff]  ;;  %v3278_v4 = vpack.c.bf16 %v207_v53, %v204_v49  ;;  %v701_v45 = vld [vmem:[#allocation7 + $0x98] sm:$0xff]  ;;  %v702_v49 = vld [vmem:[#allocation7 + $0xa0] sm:$0xff] }
 0x169   :  { %v3282_v16 = vpack.c.bf16 %v206_v7, %v203_v60  ;;  %v700_v43 = vld [vmem:[#allocation7 + $0x90] sm:$0xff]  ;;  %v703_v53 = vld [vmem:[#allocation7 + $0xa8] sm:$0xff] }
 0x16a   :  { %2315 = vmatpush1.bf16.msra.mxu1 %v3168_v5  ;;  %v2424_v48 = vpack.c.bf16 %v701_v45, %v700_v43  ;;  %v2427_v60 = vpack.c.bf16 %v703_v53, %v702_v49  ;;  %v704_v7 = vld [vmem:[#allocation7 + $0xb0] sm:$0xff]  ;;  %v707_v25 = vld [vmem:[#allocation7 + $0xc8] sm:$0xff]  ;;  %v709_v45 = vld [vmem:[#allocation7 + $0xd8] sm:$0xff] }
 0x16b   :  { %2317 = vmatprep.subr.bf16.mxu1 %v3172_v6  ;;  %v708_v43 = vld [vmem:[#allocation7 + $0xd0] sm:$0xff]  ;;  %v711_v49 = vld [vmem:[#allocation7 + $0xe8] sm:$0xff] }
 0x16e   :  { %2319 = vmatpush1.bf16.msra.mxu1 %v3175_v11 }
 0x16f   :  { %2321 = vmatprep.subr.bf16.mxu1 %v3178_v12 }
 0x172   :  { %2323 = vmatpush1.bf16.msra.mxu1 %v3181_v17 }
 0x173   :  { %2325 = vmatprep.subr.bf16.mxu1 %v3184_v18 }
 0x176   :  { %2327 = vmatpush1.bf16.msra.mxu1 %v3187_v23 }
 0x177   :  { %2329 = vmatprep.subr.bf16.mxu1 %v3190_v24 }
 0x17a   :  { %2331 = vmatpush1.bf16.msra.mxu1 %v3193_v31 }
 0x17b   :  { %2333 = vmatprep.subr.bf16.mxu1 %v3196_v33 }
 0x17e   :  { %2335 = vmatpush1.bf16.msra.mxu1 %v3199_v40 }
 0x17f   :  { %2337 = vmatprep.subr.bf16.mxu1 %v3202_v42 }
 0x182   :  { %2339 = vmatpush1.bf16.msra.mxu1 %v3205_v46 }
 0x183   :  { %2365 = vmatprep.subr.bf16.mxu1 %v3209_v51 }
 0x238   :  { %v367_v9 = vpop.f32.mrb[0].mxu1 }
 0x239   :  { %v1958_v14 = vpop.f32.mrb[1].mxu1  ;;  %452 = vmatmul.mubr.f32.vlgmr.msra.gmra.mrb[2].mxu1 %v367_v9  ;;  %1992 = vmatmul.mubr.f32.vlgmr.msra.gmra.mrb[2].mxu0 %v367_v9  ;;  %v191_v9 = vld [vmem:[#allocation10 + $0xf0] sm:$0xff] }
 0x23a   :  { %2367 = vmatpush1.bf16.msra.mxu1 %v3212_v62  ;;  %2398 = vmatpush3.bf16.msra.mxu0 %v3214_v2  ;;  %v194_v14 = vld [vmem:[#allocation10 + $0x108] sm:$0xff] }
 0x23b   :  { %2369 = vmatprep.subr.bf16.mxu1 %v3216_v3  ;;  %2399 = vmatprep.subr.bf16.mxu0 %v3540_v0  ;;  %v3262_v27 = vpack.c.bf16 %v194_v14, %v191_v9  ;;  %v205_v9 = vld [vmem:[#allocation10 + $0x160] sm:$0xff]  ;;  %v208_v14 = vld [vmem:[#allocation10 + $0x178] sm:$0xff] }
 0x23c   :  { %592 = vmatprep.mubr.f32.mxu1 %v3537_v1  ;;  %2026 = vmatprep.mubr.msk.f32.mxu0 %vm2947_vm0, %v3537_v1  ;;  %v3285_v21 = vpack.c.bf16 %v208_v14, %v205_v9  ;;  %v705_v9 = vld [vmem:[#allocation7 + $0xb8] sm:$0xff] }
 0x23d   :  { %v2430_v14 = vpack.c.bf16 %v705_v9, %v704_v7  ;;  %v713_v7 = vld [vmem:[#allocation7 + $0xf8] sm:$0xff] }
 0x23e   :  { %2371 = vmatpush1.bf16.msra.mxu1 %v3219_v15  ;;  %2401 = vmatpush3.bf16.msra.mxu0 %v3222_v19  ;;  %3558 = vst [vmem:[#allocation27_spill] sm:$0xff] %v3285_v21 }
 0x23f   :  { %2373 = vmatprep.subr.bf16.mxu1 %v3225_v20  ;;  %2402 = vmatprep.subr.bf16.mxu0 %v3540_v0 }
 0x242   :  { %2375 = vmatpush1.bf16.msra.mxu1 %v3232_v30  ;;  %2404 = vmatpush3.bf16.msra.mxu0 %v3235_v36 }
 0x243   :  { %2377 = vmatprep.subr.bf16.mxu1 %v3238_v37  ;;  %2405 = vmatprep.subr.bf16.mxu0 %v3540_v0 }
 0x246   :  { %2379 = vmatpush1.bf16.msra.mxu1 %v3242_v52  ;;  %2407 = vmatpush3.bf16.msra.mxu0 %v3245_v54 }
 0x247   :  { %2381 = vmatprep.subr.bf16.mxu1 %v3248_v55  ;;  %2408 = vmatprep.subr.bf16.mxu0 %v3540_v0 }
 0x24a   :  { %2383 = vmatpush1.bf16.msra.mxu1 %v3252_v8  ;;  %2410 = vmatpush3.bf16.msra.mxu0 %v3255_v10 }
 0x24b   :  { %2385 = vmatprep.subr.bf16.mxu1 %v3258_v13  ;;  %2411 = vmatprep.subr.bf16.mxu0 %v3540_v0 }
 0x24e   :  { %2387 = vmatpush1.bf16.msra.mxu1 %v3262_v27  ;;  %2413 = vmatpush3.bf16.msra.mxu0 %v3265_v34 }
 0x24f   :  { %2389 = vmatprep.subr.bf16.mxu1 %v3268_v39  ;;  %2414 = vmatprep.subr.bf16.mxu0 %v3540_v0 }
 0x252   :  { %2391 = vmatpush1.bf16.msra.mxu1 %v3272_v56  ;;  %2416 = vmatpush3.bf16.msra.mxu0 %v3275_v63 }
 0x253   :  { %2393 = vmatprep.subr.bf16.mxu1 %v3278_v4  ;;  %2417 = vmatprep.subr.bf16.mxu0 %v3540_v0 }
 0x256   :  { %2395 = vmatpush1.bf16.msra.mxu1 %v3282_v16  ;;  %2419 = vmatpush3.bf16.msra.mxu0 %v3285_v21 }
 0x257   :  { %2420 = vmatprep.subr.bf16.mxu1 %v3540_v0  ;;  %2476 = vmatprep.subr.bf16.mxu0 %v3540_v0 }
 0x259   :  { %593 = vmatmul.mubr.f32.vlgmr.msra.gmra.mrb[2].mxu1 %v3118_v26  ;;  %2027 = vmatmul.mubr.f32.vlgmr.msra.gmra.mrb[4].mxu0 %v3118_v26 }
 0x25a   :  { %2061 = vmatprep.mubr.msk.f32.mxu1 %vm2947_vm0, %v3537_v1  ;;  %2478 = vmatpush3.bf16.msra.mxu0 %v3124_v29 }
 0x25b   :  { %2479 = vmatprep.subr.bf16.mxu0 %v3540_v0  ;;  %2101 = vmatprep.mubr.msk.f32.mxu0 %vm2947_vm0, %v3537_v1  ;;  %v710_v1 = vld [vmem:[#allocation7 + $0xe0] sm:$0xff] }
 0x25c   :  { %2422 = vmatpush3.bf16.msra.mxu1 %v2421_v28  ;;  %v2433_v28 = vpack.c.bf16 %v707_v25, %v706_v22  ;;  %v2439_v53 = vpack.c.bf16 %v711_v49, %v710_v1  ;;  %v209_v1 = vld [vmem:[%s3532_s5] sm:$0x7] }
 0x25d   :  { %2423 = vmatprep.subr.bf16.mxu1 %v3540_v0 }
 0x25e   :  { %2481 = vmatpush3.bf16.msra.mxu0 %v3128_v32 }
 0x25f   :  { %2482 = vmatprep.subr.bf16.mxu0 %v3540_v0 }
 0x260   :  { %2425 = vmatpush3.bf16.msra.mxu1 %v2424_v48  ;;  %v2436_v48 = vpack.c.bf16 %v709_v45, %v708_v43 }
 0x261   :  { %2426 = vmatprep.subr.bf16.mxu1 %v3540_v0 }
 0x262   :  { %2484 = vmatpush3.bf16.msra.mxu0 %v3132_v35 }
 0x263   :  { %2485 = vmatprep.subr.bf16.mxu0 %v3540_v0 }
 0x264   :  { %2428 = vmatpush3.bf16.msra.mxu1 %v2427_v60  ;;  %v712_v60 = vld [vmem:[#allocation7 + $0xf0] sm:$0xff] }
 0x265   :  { %2429 = vmatprep.subr.bf16.mxu1 %v3540_v0  ;;  %v2442_v9 = vpack.c.bf16 %v713_v7, %v712_v60 }
 0x266   :  { %2487 = vmatpush3.bf16.msra.mxu0 %v3136_v38 }
 0x267   :  { %2488 = vmatprep.subr.bf16.mxu0 %v3540_v0 }
 0x268   :  { %2431 = vmatpush3.bf16.msra.mxu1 %v2430_v14  ;;  %v3559_v14 = vmov 0.0  }
 0x269   :  { %2432 = vmatprep.subr.bf16.mxu1 %v3540_v0 }
 0x26a   :  { %2490 = vmatpush3.bf16.msra.mxu0 %v3140_v41 }
 0x26b   :  { %2491 = vmatprep.subr.bf16.mxu0 %v3540_v0 }
 0x26c   :  { %2434 = vmatpush3.bf16.msra.mxu1 %v2433_v28  ;;  %v372_v28 = vlaneseq }
 0x26d   :  { %2435 = vmatprep.subr.bf16.mxu1 %v3540_v0 }
 0x26e   :  { %2493 = vmatpush3.bf16.msra.mxu0 %v3144_v44 }
 0x26f   :  { %2494 = vmatprep.subr.bf16.mxu0 %v3540_v0 }
 0x270   :  { %2437 = vmatpush3.bf16.msra.mxu1 %v2436_v48 }
 0x271   :  { %2438 = vmatprep.subr.bf16.mxu1 %v3540_v0 }
 0x272   :  { %2496 = vmatpush3.bf16.msra.mxu0 %v3148_v47 }
 0x273   :  { %2497 = vmatprep.subr.bf16.mxu0 %v3540_v0 }
 0x274   :  { %2440 = vmatpush3.bf16.msra.mxu1 %v2439_v53 }
 0x275   :  { %2441 = vmatprep.subr.bf16.mxu1 %v3540_v0 }
 0x276   :  { %2499 = vmatpush3.bf16.msra.mxu0 %v3152_v50  ;;  %v373_v50 = vshrl.u32 %v372_v28, 7 }
 0x277   :  { %2532 = vmatprep.subr.bf16.mxu0 %v3540_v0 }
 0x278   :  { %2443 = vmatpush3.bf16.msra.mxu1 %v2442_v9  ;;  %v374_v43 = vsub.s32 0, %v373_v50  ;;  %v378_v45 = vsub.s32 1, %v373_v50  ;;  %v382_v38 = vsub.s32 2, %v373_v50 }
 0x279   :  { %2064 = vmatprep.subr.mxu1 %v3559_v14 }
 0x27a   :  { %v3326_v48 = vrot.slane %v209_v1, %v374_v43  ;;  %v3328_v53 = vrot.slane %v209_v1, %v378_v45  ;;  %v3335_v45 = vld [vmem:[%s3533_s6] ss:$0 sm:$0xff]  ;;  %v3337_v35 = vrot.slane %v209_v1, %v382_v38 }
 0x30c   :  { %v524_v22 = vpop.f32.mrb[2].mxu0 }
 0x30d   :  { %v1993_v25 = vpop.f32.mrb[3].mxu0 }
 0x32c   :  { %v594_v49 = vpop.f32.mrb[2].mxu1  ;;  %v665_v60 = vpop.f32.mrb[4].mxu0 }
 0x32d   :  { %v2716_v7 = vadd.f32 %v594_v49, %v3326_v48  ;;  %v596_v9 = vpop.f32.mrb[3].mxu1  ;;  %v2028_v0 = vpop.f32.mrb[5].mxu0 }
 0x32e   :  { %v2717_v25 = vadd.f32 %v596_v9, %v3328_v53  ;;  %v689_v0 = vadd.f32 %v3335_v45, %v665_v60  ;;  %v1159_v60 = vld [vmem:[#allocation7 + $0x100] sm:$0xff] }
 0x32f   :  { %v1733_v47 = vmul.f32 -1.442695, %v2716_v7 }
 0x330   :  { %v1734_v28 = vmul.f32 -1.442695, %v2717_v25 }
 0x331   :  { %2742 = vpow2.f32 %v1733_v47  ;;  %v525_v47 = vadd.f32 %v524_v22, %v3337_v35  ;;  %v3560_v22 = vmov 0.0|0.0  }
 0x332   :  { %2744 = vpow2.f32 %v1734_v28 }
 0x33b   :  { %v2743_v44 = vpop.eup %2742 }
 0x33c   :  { %v673_v41 = vadd.f32 1.0, %v2743_v44  ;;  %v2745_v43 = vpop.eup %2744 }
 0x33d   :  { %v680_v49 = vadd.f32 1.0, %v2745_v43  ;;  %v1160_v43 = vld [vmem:[#allocation7 + $0x108] sm:$0xff] }
 0x33e   :  { %2746 = vrcp.f32 %v673_v41 }
 0x33f   :  { %2748 = vrcp.f32 %v680_v49  ;;  %v2557_v49 = vpack.c.bf16 %v1160_v43, %v1159_v60  ;;  %v1170_v60 = vld [vmem:[#allocation7 + $0x158] sm:$0xff] }
 0x348   :  { %v2747_v7 = vpop.eup %2746 }
 0x349   :  { %v690_v9 = vmul.f32 %v2747_v7, %v689_v0  ;;  %v2749_v41 = vpop.eup %2748  ;;  %v1161_v0 = vld [vmem:[#allocation7 + $0x110] sm:$0xff]  ;;  %v1162_v7 = vld [vmem:[#allocation7 + $0x118] sm:$0xff] }
 0x34a   :  { %v693_v44 = vsub.f32 1.0, %v2749_v41  ;;  %v695_v32 = vmul.f32 %v2749_v41, %v3118_v26 }
 0x34b   :  { %v691_v25 = vadd.f32 %v690_v9, %v525_v47  ;;  %v2560_v47 = vpack.c.bf16 %v1162_v7, %v1161_v0  ;;  %v1163_v9 = vld [vmem:[#allocation7 + $0x120] sm:$0xff]  ;;  %v1172_v0 = vld [vmem:[#allocation7 + $0x168] sm:$0xff] }
 0x34d   :  { %2750 = vtanh.f32 %v691_v25  ;;  %v1164_v25 = vld [vmem:[#allocation7 + $0x128] sm:$0xff] }
 0x34e   :  { %v2563_v41 = vpack.c.bf16 %v1164_v25, %v1163_v9  ;;  %v1174_v9 = vld [vmem:[#allocation7 + $0x178] sm:$0xff] }
 0x357   :  { %v2751_v50 = vpop.eup %2750 }
 0x358   :  { %v694_v28 = vmul.f32 %v2751_v50, %v693_v44  ;;  %v1165_v44 = vld [vmem:[#allocation7 + $0x130] sm:$0xff]  ;;  %v1166_v50 = vld [vmem:[#allocation7 + $0x138] sm:$0xff] }
 0x35a   :  { %v3342_v29 = vadd.f32 %v695_v32, %v694_v28  ;;  %v2566_v28 = vpack.c.bf16 %v1166_v50, %v1165_v44 }
 0x35c   :  { %2062 = vmatmul.mubr.f32.vlgmr.msra.gmra.mrb[4].mxu1 %v3342_v29 }
 0x35d   :  { %2066 = vmatprep.mubr.msk.f32.mxu1 %vm2947_vm0, %v3559_v14 }
 0x42f   :  { %v780_v38 = vpop.f32.mrb[4].mxu1 }
 0x430   :  { %v2063_v1 = vpop.f32.mrb[5].mxu1  ;;  %2065 = vmatpush3.msra.mxu1 %v780_v38  ;;  %v1167_v38 = vld [vmem:[#allocation7 + $0x140] sm:$0xff] }
 0x431   :  { %2067 = vmatmul.mubr.msk.f32.vlgmr.msra.gmra.mrb[6].mxu1 %vm297_vm1, %v3158_v58  ;;  %2445 = vmatprep.subr.bf16.mxu1 %v3156_v57  ;;  %v1168_v1 = vld [vmem:[#allocation7 + $0x148] sm:$0xff] }
 0x432   :  { %2447 = vmatpush1.bf16.msra.mxu1 %v3160_v59  ;;  %918 = vmatprep.mubr.f32.mxu1 %v3559_v14 }
 0x433   :  { %2449 = vmatprep.subr.bf16.mxu1 %v3162_v61 }
 0x436   :  { %2451 = vmatpush1.bf16.msra.mxu1 %v3168_v5 }
 0x437   :  { %2453 = vmatprep.subr.bf16.mxu1 %v3172_v6 }
 0x43a   :  { %2455 = vmatpush1.bf16.msra.mxu1 %v3175_v11 }
 0x43b   :  { %2457 = vmatprep.subr.bf16.mxu1 %v3178_v12 }
 0x43e   :  { %2459 = vmatpush1.bf16.msra.mxu1 %v3181_v17 }
 0x43f   :  { %2461 = vmatprep.subr.bf16.mxu1 %v3184_v18 }
 0x442   :  { %2463 = vmatpush1.bf16.msra.mxu1 %v3187_v23 }
 0x443   :  { %2465 = vmatprep.subr.bf16.mxu1 %v3190_v24 }
 0x446   :  { %2467 = vmatpush1.bf16.msra.mxu1 %v3193_v31 }
 0x447   :  { %2469 = vmatprep.subr.bf16.mxu1 %v3196_v33 }
 0x44a   :  { %2471 = vmatpush1.bf16.msra.mxu1 %v3199_v40 }
 0x44b   :  { %2473 = vmatprep.subr.bf16.mxu1 %v3202_v42 }
 0x44e   :  { %2475 = vmatpush1.bf16.msra.mxu1 %v3205_v46 }
 0x44f   :  { %2501 = vmatprep.subr.bf16.mxu1 %v3209_v51 }
 0x504   :  { %v850_v26 = vpop.f32.mrb[6].mxu1 }
 0x505   :  { %v2068_v32 = vpop.f32.mrb[7].mxu1  ;;  %919 = vmatmul.mubr.f32.vlgmr.msra.gmra.mrb[8].mxu1 %v850_v26  ;;  %2102 = vmatmul.mubr.f32.vlgmr.msra.gmra.mrb[6].mxu0 %v850_v26  ;;  %v2569_v26 = vpack.c.bf16 %v1168_v1, %v1167_v38 }
 0x506   :  { %2503 = vmatpush1.bf16.msra.mxu1 %v3212_v62  ;;  %2534 = vmatpush3.bf16.msra.mxu0 %v3214_v2  ;;  %v1169_v32 = vld [vmem:[#allocation7 + $0x150] sm:$0xff] }
 0x507   :  { %2505 = vmatprep.subr.bf16.mxu1 %v3216_v3  ;;  %2535 = vmatprep.subr.bf16.mxu0 %v3560_v22  ;;  %v2572_v43 = vpack.c.bf16 %v1170_v60, %v1169_v32 }
 0x508   :  { %1059 = vmatprep.mubr.f32.mxu1 %v3559_v14  ;;  %2136 = vmatprep.mubr.msk.f32.mxu0 %vm2947_vm0, %v3559_v14 }
 0x50a   :  { %2507 = vmatpush1.bf16.msra.mxu1 %v3219_v15  ;;  %2537 = vmatpush3.bf16.msra.mxu0 %v3222_v19 }
 0x50b   :  { %2509 = vmatprep.subr.bf16.mxu1 %v3225_v20  ;;  %2538 = vmatprep.subr.bf16.mxu0 %v3560_v22 }
 0x50e   :  { %2511 = vmatpush1.bf16.msra.mxu1 %v3232_v30  ;;  %2540 = vmatpush3.bf16.msra.mxu0 %v3235_v36 }
 0x50f   :  { %2513 = vmatprep.subr.bf16.mxu1 %v3238_v37  ;;  %2541 = vmatprep.subr.bf16.mxu0 %v3560_v22 }
 0x512   :  { %2515 = vmatpush1.bf16.msra.mxu1 %v3242_v52  ;;  %2543 = vmatpush3.bf16.msra.mxu0 %v3245_v54 }
 0x513   :  { %2517 = vmatprep.subr.bf16.mxu1 %v3248_v55  ;;  %2544 = vmatprep.subr.bf16.mxu0 %v3560_v22 }
 0x516   :  { %2519 = vmatpush1.bf16.msra.mxu1 %v3252_v8  ;;  %2546 = vmatpush3.bf16.msra.mxu0 %v3255_v10 }
 0x517   :  { %2521 = vmatprep.subr.bf16.mxu1 %v3258_v13  ;;  %2547 = vmatprep.subr.bf16.mxu0 %v3560_v22 }
 0x51a   :  { %2523 = vmatpush1.bf16.msra.mxu1 %v3262_v27  ;;  %2549 = vmatpush3.bf16.msra.mxu0 %v3265_v34 }
 0x51b   :  { %2525 = vmatprep.subr.bf16.mxu1 %v3268_v39  ;;  %2550 = vmatprep.subr.bf16.mxu0 %v3560_v22 }
 0x51e   :  { %2527 = vmatpush1.bf16.msra.mxu1 %v3272_v56  ;;  %2552 = vmatpush3.bf16.msra.mxu0 %v3275_v63 }
 0x51f   :  { %2529 = vmatprep.subr.bf16.mxu1 %v3278_v4  ;;  %2553 = vmatprep.subr.bf16.mxu0 %v3560_v22 }
 0x522   :  { %2531 = vmatpush1.bf16.msra.mxu1 %v3282_v16  ;;  %2555 = vmatpush3.bf16.msra.mxu0 %v3285_v21 }
 0x523   :  { %2556 = vmatprep.subr.bf16.mxu1 %v3560_v22  ;;  %2174 = vmatprep.subr.mxu0 %v3559_v14 }
 0x525   :  { %1060 = vmatmul.mubr.f32.vlgmr.msra.gmra.mrb[8].mxu1 %v3342_v29  ;;  %2137 = vmatmul.mubr.f32.vlgmr.msra.gmra.mrb[8].mxu0 %v3342_v29 }
 0x526   :  { %2171 = vmatprep.mubr.msk.f32.mxu1 %vm2947_vm0, %v3559_v14  ;;  %2176 = vmatprep.mubr.msk.f32.mxu0 %vm2947_vm0, %v3559_v14 }
 0x527   :  { %2558 = vmatpush3.bf16.msra.mxu1 %v2557_v49  ;;  %v1171_v49 = vld [vmem:[#allocation7 + $0x160] sm:$0xff] }
 0x528   :  { %2559 = vmatprep.subr.bf16.mxu1 %v3560_v22  ;;  %v2575_v7 = vpack.c.bf16 %v1172_v0, %v1171_v49 }
 0x52b   :  { %2561 = vmatpush3.bf16.msra.mxu1 %v2560_v47  ;;  %v1173_v47 = vld [vmem:[#allocation7 + $0x170] sm:$0xff] }
 0x52c   :  { %2562 = vmatprep.subr.bf16.mxu1 %v3560_v22  ;;  %v2578_v25 = vpack.c.bf16 %v1174_v9, %v1173_v47 }
 0x52f   :  { %2564 = vmatpush3.bf16.msra.mxu1 %v2563_v41 }
 0x530   :  { %2565 = vmatprep.subr.bf16.mxu1 %v3560_v22 }
 0x533   :  { %2567 = vmatpush3.bf16.msra.mxu1 %v2566_v28 }
 0x534   :  { %2568 = vmatprep.subr.bf16.mxu1 %v3560_v22 }
 0x537   :  { %2570 = vmatpush3.bf16.msra.mxu1 %v2569_v26 }
 0x538   :  { %2571 = vmatprep.subr.bf16.mxu1 %v3560_v22 }
 0x53b   :  { %2573 = vmatpush3.bf16.msra.mxu1 %v2572_v43 }
 0x53c   :  { %2574 = vmatprep.subr.bf16.mxu1 %v3560_v22 }
 0x53f   :  { %2576 = vmatpush3.bf16.msra.mxu1 %v2575_v7 }
 0x540   :  { %2577 = vmatprep.subr.bf16.mxu1 %v3560_v22 }
 0x543   :  { %2579 = vmatpush3.bf16.msra.mxu1 %v2578_v25 }
 0x544   :  { %2612 = vmatprep.subr.bf16.mxu1 %v3560_v22 }
 0x5d8   :  { %v991_v41 = vpop.f32.mrb[6].mxu0 }
 0x5d9   :  { %v2103_v44 = vpop.f32.mrb[7].mxu0 }
 0x5da   :  { %v992_v44 = vadd.f32 %v991_v41, %v3337_v35  ;;  %v3562_v41 = vld [vmem:[#allocation20_spill] sm:$0xff] }
 0x5f8   :  { %v1061_v50 = vpop.f32.mrb[8].mxu1  ;;  %v1132_v28 = vpop.f32.mrb[8].mxu0 }
 0x5f9   :  { %v2718_v38 = vadd.f32 %v1061_v50, %v3326_v48  ;;  %v1063_v1 = vpop.f32.mrb[9].mxu1  ;;  %v2138_v26 = vpop.f32.mrb[9].mxu0  ;;  %v1150_v9 = vadd.f32 %v3335_v45, %v1132_v28  ;;  %v3565_v28 = vld [vmem:[#allocation23_spill] sm:$0xff] }
 0x5fa   :  { %v2719_v60 = vadd.f32 %v1063_v1, %v3328_v53 }
 0x5fb   :  { %v1737_v32 = vmul.f32 -1.442695, %v2718_v38 }
 0x5fc   :  { %v1738_v43 = vmul.f32 -1.442695, %v2719_v60 }
 0x5fd   :  { %2752 = vpow2.f32 %v1737_v32 }
 0x5fe   :  { %2754 = vpow2.f32 %v1738_v43 }
 0x607   :  { %v2753_v49 = vpop.eup %2752 }
 0x608   :  { %v1140_v0 = vadd.f32 1.0, %v2753_v49  ;;  %v2755_v7 = vpop.eup %2754  ;;  %v3561_v49 = vld [vmem:[#allocation19_spill] sm:$0xff] }
 0x609   :  { %v1147_v47 = vadd.f32 1.0, %v2755_v7  ;;  %v3567_v7 = vld [vmem:[#allocation25_spill] sm:$0xff] }
 0x60a   :  { %2756 = vrcp.f32 %v1140_v0  ;;  %v3566_v0 = vld [vmem:[#allocation24_spill] sm:$0xff] }
 0x60b   :  { %2758 = vrcp.f32 %v1147_v47  ;;  %v3568_v47 = vld [vmem:[#allocation26_spill] sm:$0xff] }
 0x614   :  { %v2757_v25 = vpop.eup %2756 }
 0x615   :  { %v1151_v21 = vmul.f32 %v2757_v25, %v1150_v9  ;;  %v2759_v38 = vpop.eup %2758 }
 0x616   :  { %v1154_v26 = vsub.f32 1.0, %v2759_v38  ;;  %v1156_v60 = vmul.f32 %v2759_v38, %v3342_v29  ;;  %v3564_v29 = vld [vmem:[#allocation22_spill] sm:$0xff] }
 0x617   :  { %v1152_v50 = vadd.f32 %v1151_v21, %v992_v44  ;;  %v3563_v21 = vld [vmem:[#allocation21_spill] sm:$0xff] }
 0x619   :  { %2760 = vtanh.f32 %v1152_v50 }
 0x623   :  { %v2761_v1 = vpop.eup %2760 }
 0x624   :  { %v1155_v32 = vmul.f32 %v2761_v1, %v1154_v26 }
 0x626   :  { %v3421_v43 = vadd.f32 %v1156_v60, %v1155_v32 }
 0x628   :  { %2172 = vmatmul.mubr.f32.vlgmr.msra.gmra.mrb[10].mxu1 %v3421_v43 }
 0x629   :  { %2614 = vmatpush3.bf16.msra.mxu1 %v3561_v49  ;;  %2211 = vmatprep.mubr.msk.f32.mxu1 %vm2947_vm0, %v3559_v14 }
 0x62a   :  { %2615 = vmatprep.subr.bf16.mxu1 %v3560_v22 }
 0x62d   :  { %2617 = vmatpush3.bf16.msra.mxu1 %v3562_v41 }
 0x62e   :  { %2618 = vmatprep.subr.bf16.mxu1 %v3560_v22 }
 0x631   :  { %2620 = vmatpush3.bf16.msra.mxu1 %v3563_v21 }
 0x632   :  { %2621 = vmatprep.subr.bf16.mxu1 %v3560_v22 }
 0x635   :  { %2623 = vmatpush3.bf16.msra.mxu1 %v3564_v29 }
 0x636   :  { %2624 = vmatprep.subr.bf16.mxu1 %v3560_v22 }
 0x639   :  { %2626 = vmatpush3.bf16.msra.mxu1 %v3565_v28 }
 0x63a   :  { %2627 = vmatprep.subr.bf16.mxu1 %v3560_v22 }
 0x63d   :  { %2629 = vmatpush3.bf16.msra.mxu1 %v3566_v0 }
 0x63e   :  { %2630 = vmatprep.subr.bf16.mxu1 %v3560_v22 }
 0x641   :  { %2632 = vmatpush3.bf16.msra.mxu1 %v3567_v7 }
 0x642   :  { %2633 = vmatprep.subr.bf16.mxu1 %v3560_v22 }
 0x645   :  { %2635 = vmatpush3.bf16.msra.mxu1 %v3568_v47 }
 0x646   :  { %2668 = vmatprep.subr.bf16.mxu1 %v3560_v22 }
 0x6fb   :  { %v1241_v9 = vpop.f32.mrb[10].mxu1 }
 0x6fc   :  { %v2173_v25 = vpop.f32.mrb[11].mxu1  ;;  %2175 = vmatpush3.msra.mxu0 %v1241_v9 }
 0x6fd   :  { %2177 = vmatmul.mubr.msk.f32.vlgmr.msra.gmra.mrb[10].mxu0 %vm297_vm1, %v3158_v58  ;;  %2581 = vmatprep.subr.bf16.mxu0 %v3156_v57 }
 0x6fe   :  { %2583 = vmatpush1.bf16.msra.mxu0 %v3160_v59  ;;  %1379 = vmatprep.mubr.f32.mxu0 %v3559_v14  ;;  %v3569_v59 = vld [vmem:[#allocation27_spill] sm:$0xff] }
 0x6ff   :  { %2585 = vmatprep.subr.bf16.mxu0 %v3162_v61  ;;  %v1620_v61 = vld [vmem:[#allocation11] sm:$0xff] }
 0x702   :  { %2587 = vmatpush1.bf16.msra.mxu0 %v3168_v5  ;;  %v1621_v5 = vld [vmem:[#allocation11 + $0x8] sm:$0xff] }
 0x703   :  { %2589 = vmatprep.subr.bf16.mxu0 %v3172_v6  ;;  %v2693_v6 = vpack.c.bf16 %v1621_v5, %v1620_v61 }
 0x706   :  { %2591 = vmatpush1.bf16.msra.mxu0 %v3175_v11  ;;  %v1622_v11 = vld [vmem:[#allocation11 + $0x10] sm:$0xff] }
 0x707   :  { %2593 = vmatprep.subr.bf16.mxu0 %v3178_v12  ;;  %v1623_v12 = vld [vmem:[#allocation11 + $0x18] sm:$0xff] }
 0x70a   :  { %2595 = vmatpush1.bf16.msra.mxu0 %v3181_v17  ;;  %v2696_v17 = vpack.c.bf16 %v1623_v12, %v1622_v11 }
 0x70b   :  { %2597 = vmatprep.subr.bf16.mxu0 %v3184_v18  ;;  %v1624_v18 = vld [vmem:[#allocation11 + $0x20] sm:$0xff] }
 0x70e   :  { %2599 = vmatpush1.bf16.msra.mxu0 %v3187_v23  ;;  %v1625_v23 = vld [vmem:[#allocation11 + $0x28] sm:$0xff] }
 0x70f   :  { %2601 = vmatprep.subr.bf16.mxu0 %v3190_v24  ;;  %v2699_v24 = vpack.c.bf16 %v1625_v23, %v1624_v18 }
 0x712   :  { %2603 = vmatpush1.bf16.msra.mxu0 %v3193_v31  ;;  %v1626_v31 = vld [vmem:[#allocation11 + $0x30] sm:$0xff] }
 0x713   :  { %2605 = vmatprep.subr.bf16.mxu0 %v3196_v33  ;;  %v1627_v33 = vld [vmem:[#allocation11 + $0x38] sm:$0xff] }
 0x716   :  { %2607 = vmatpush1.bf16.msra.mxu0 %v3199_v40  ;;  %v2702_v40 = vpack.c.bf16 %v1627_v33, %v1626_v31 }
 0x717   :  { %2609 = vmatprep.subr.bf16.mxu0 %v3202_v42  ;;  %v1628_v42 = vld [vmem:[#allocation11 + $0x40] sm:$0xff] }
 0x71a   :  { %2611 = vmatpush1.bf16.msra.mxu0 %v3205_v46  ;;  %v1629_v46 = vld [vmem:[#allocation11 + $0x48] sm:$0xff] }
 0x71b   :  { %2637 = vmatprep.subr.bf16.mxu0 %v3209_v51  ;;  %v2705_v51 = vpack.c.bf16 %v1629_v46, %v1628_v42 }
 0x7d0   :  { %v1311_v57 = vpop.f32.mrb[10].mxu0 }
 0x7d1   :  { %1380 = vmatmul.mubr.f32.vlgmr.msra.gmra.mrb[12].mxu0 %v1311_v57  ;;  %2212 = vmatmul.mubr.f32.vlgmr.msra.gmra.mrb[12].mxu1 %v1311_v57  ;;  %v2178_v58 = vpop.f32.mrb[11].mxu0 }
 0x7d2   :  { %2639 = vmatpush1.bf16.msra.mxu0 %v3212_v62  ;;  %2670 = vmatpush3.bf16.msra.mxu1 %v3214_v2  ;;  %v1630_v62 = vld [vmem:[#allocation11 + $0x50] sm:$0xff]  ;;  %v1631_v2 = vld [vmem:[#allocation11 + $0x58] sm:$0xff] }
 0x7d3   :  { %2641 = vmatprep.subr.bf16.mxu0 %v3216_v3  ;;  %2671 = vmatprep.subr.bf16.mxu1 %v3560_v22  ;;  %v2708_v3 = vpack.c.bf16 %v1631_v2, %v1630_v62 }
 0x7d4   :  { %1520 = vmatprep.mubr.f32.mxu0 %v3559_v14  ;;  %2246 = vmatprep.mubr.msk.f32.mxu1 %vm2947_vm0, %v3559_v14 }
 0x7d6   :  { %2643 = vmatpush1.bf16.msra.mxu0 %v3219_v15  ;;  %2673 = vmatpush3.bf16.msra.mxu1 %v3222_v19  ;;  %v1632_v15 = vld [vmem:[#allocation11 + $0x60] sm:$0xff]  ;;  %v1633_v19 = vld [vmem:[#allocation11 + $0x68] sm:$0xff] }
 0x7d7   :  { %2645 = vmatprep.subr.bf16.mxu0 %v3225_v20  ;;  %2674 = vmatprep.subr.bf16.mxu1 %v3560_v22  ;;  %v2711_v20 = vpack.c.bf16 %v1633_v19, %v1632_v15 }
 0x7da   :  { %2647 = vmatpush1.bf16.msra.mxu0 %v3232_v30  ;;  %2676 = vmatpush3.bf16.msra.mxu1 %v3235_v36  ;;  %v1634_v30 = vld [vmem:[#allocation11 + $0x70] sm:$0xff]  ;;  %v1635_v36 = vld [vmem:[#allocation11 + $0x78] sm:$0xff] }
 0x7db   :  { %2649 = vmatprep.subr.bf16.mxu0 %v3238_v37  ;;  %2677 = vmatprep.subr.bf16.mxu1 %v3560_v22  ;;  %v2714_v37 = vpack.c.bf16 %v1635_v36, %v1634_v30 }
 0x7de   :  { %2651 = vmatpush1.bf16.msra.mxu0 %v3242_v52  ;;  %2679 = vmatpush3.bf16.msra.mxu1 %v3245_v54 }
 0x7df   :  { %2653 = vmatprep.subr.bf16.mxu0 %v3248_v55  ;;  %2680 = vmatprep.subr.bf16.mxu1 %v3560_v22 }
 0x7e2   :  { %2655 = vmatpush1.bf16.msra.mxu0 %v3252_v8  ;;  %2682 = vmatpush3.bf16.msra.mxu1 %v3255_v10 }
 0x7e3   :  { %2657 = vmatprep.subr.bf16.mxu0 %v3258_v13  ;;  %2683 = vmatprep.subr.bf16.mxu1 %v3560_v22 }
 0x7e6   :  { %2659 = vmatpush1.bf16.msra.mxu0 %v3262_v27  ;;  %2685 = vmatpush3.bf16.msra.mxu1 %v3265_v34 }
 0x7e7   :  { %2661 = vmatprep.subr.bf16.mxu0 %v3268_v39  ;;  %2686 = vmatprep.subr.bf16.mxu1 %v3560_v22 }
 0x7ea   :  { %2663 = vmatpush1.bf16.msra.mxu0 %v3272_v56  ;;  %2688 = vmatpush3.bf16.msra.mxu1 %v3275_v63 }
 0x7eb   :  { %2665 = vmatprep.subr.bf16.mxu0 %v3278_v4  ;;  %2689 = vmatprep.subr.bf16.mxu1 %v3560_v22 }
 0x7ee   :  { %2667 = vmatpush1.bf16.msra.mxu0 %v3282_v16  ;;  %2691 = vmatpush3.bf16.msra.mxu1 %v3569_v59 }
 0x7ef   :  { %2692 = vmatprep.subr.bf16.mxu0 %v3560_v22 }
 0x7f1   :  { %1521 = vmatmul.mubr.f32.vlgmr.msra.gmra.mrb[12].mxu0 %v3421_v43  ;;  %2247 = vmatmul.mubr.f32.vlgmr.msra.gmra.mrb[14].mxu1 %v3421_v43 }
 0x7f2   :  { %2281 = vmatprep.mubr.msk.f32.mxu0 %vm2947_vm0, %v3559_v14  ;;  %2694 = vmatpush3.bf16.msra.mxu0 %v2693_v6 }
 0x7f3   :  { %2695 = vmatprep.subr.bf16.mxu0 %v3560_v22 }
 0x7f6   :  { %2697 = vmatpush3.bf16.msra.mxu0 %v2696_v17 }
 0x7f7   :  { %2698 = vmatprep.subr.bf16.mxu0 %v3560_v22 }
 0x7fa   :  { %2700 = vmatpush3.bf16.msra.mxu0 %v2699_v24 }
 0x7fb   :  { %2701 = vmatprep.subr.bf16.mxu0 %v3560_v22 }
 0x7fe   :  { %2703 = vmatpush3.bf16.msra.mxu0 %v2702_v40 }
 0x7ff   :  { %2704 = vmatprep.subr.bf16.mxu0 %v3560_v22 }
 0x802   :  { %2706 = vmatpush3.bf16.msra.mxu0 %v2705_v51 }
 0x803   :  { %2707 = vmatprep.subr.bf16.mxu0 %v3560_v22 }
 0x806   :  { %2709 = vmatpush3.bf16.msra.mxu0 %v2708_v3 }
 0x807   :  { %2710 = vmatprep.subr.bf16.mxu0 %v3560_v22 }
 0x80a   :  { %2712 = vmatpush3.bf16.msra.mxu0 %v2711_v20 }
 0x80b   :  { %2713 = vmatprep.subr.bf16.mxu0 %v3560_v22 }
 0x80e   :  { %2715 = vmatpush3.bf16.msra.mxu0 %v2714_v37 }
 0x8a4   :  { %v1452_v52 = vpop.f32.mrb[12].mxu1 }
 0x8a5   :  { %v2213_v54 = vpop.f32.mrb[13].mxu1  ;;  %v1453_v50 = vadd.f32 %v1452_v52, %v3337_v35 }
 0x8c4   :  { %v1522_v55 = vpop.f32.mrb[12].mxu0  ;;  %v1593_v8 = vpop.f32.mrb[14].mxu1 }
 0x8c5   :  { %v2720_v10 = vadd.f32 %v1522_v55, %v3326_v48  ;;  %v1524_v13 = vpop.f32.mrb[13].mxu0  ;;  %v2248_v27 = vpop.f32.mrb[15].mxu1  ;;  %v1611_v22 = vadd.f32 %v3335_v45, %v1593_v8  ;;  %v1742_v45 = vld [vmem:[%s3535_s8] ss:$0 sm:$0xff] }
 0x8c6   :  { %v2721_v39 = vadd.f32 %v1524_v13, %v3328_v53 }
 0x8c7   :  { %v1740_v34 = vmul.f32 -1.442695, %v2720_v10 }
 0x8c8   :  { %v1741_v56 = vmul.f32 -1.442695, %v2721_v39 }
 0x8c9   :  { %2762 = vpow2.f32 %v1740_v34 }
 0x8ca   :  { %2764 = vpow2.f32 %v1741_v56 }
 0x8d3   :  { %v2763_v63 = vpop.eup %2762 }
 0x8d4   :  { %v1601_v4 = vadd.f32 1.0, %v2763_v63  ;;  %v2765_v16 = vpop.eup %2764 }
 0x8d5   :  { %v1608_v14 = vadd.f32 1.0, %v2765_v16 }
 0x8d6   :  { %2766 = vrcp.f32 %v1601_v4 }
 0x8d7   :  { %2768 = vrcp.f32 %v1608_v14 }
 0x8e0   :  { %v2767_v44 = vpop.eup %2766 }
 0x8e1   :  { %v1612_v38 = vmul.f32 %v2767_v44, %v1611_v22  ;;  %v2769_v26 = vpop.eup %2768 }
 0x8e2   :  { %v1615_v1 = vsub.f32 1.0, %v2769_v26  ;;  %v1617_v60 = vmul.f32 %v2769_v26, %v3421_v43 }
 0x8e3   :  { %v1613_v48 = vadd.f32 %v1612_v38, %v1453_v50 }
 0x8e5   :  { %2770 = vtanh.f32 %v1613_v48 }
 0x8ef   :  { %v2771_v53 = vpop.eup %2770 }
 0x8f0   :  { %v1616_v32 = vmul.f32 %v2771_v53, %v1615_v1 }
 0x8f2   :  { %v1618_v49 = vadd.f32 %v1617_v60, %v1616_v32 }
 0x8f4   :  { %v1619_v41 = vmax.f32 %v1618_v49, 0.0 }
 0x8f6   :  { %2282 = vmatmul.mubr.f32.vlgmr.msra.gmra.mrb[14].mxu0 %v1619_v41 }
 0x9c9   :  { %v1709_v35 = vpop.f32.mrb[14].mxu0 }
 0x9ca   :  { %v1710_v21 = vadd.f32 %v1742_v45, %v1709_v35  ;;  %v2283_v29 = vpop.f32.mrb[15].mxu0 }
 0x9cc   :  { %1713 = vst [vmem:[#allocation13] sm:$0xff] %v1710_v21 }
 0x9cd   :  { %2915 = shalt.err (!%p2912_p10)
}
 0x9ce   :  { %s2916_s3 = scalar_lea.hbm %s3536_s9, 128 }
 0x9cf   :  { %p2917_p11 = scmp.ne.s32.totalorder %s3536_s9, %s2916_s3  ;;  %p2920_p12 = scmp.lt.u32.totalorder %s2916_s3, %s3536_s9 }
 0x9d1   :  { %p2922_p13 = pnand %p2920_p12, %p2917_p11 }
 0x9d3   :  { %2925 = shalt.err (!%p2922_p13)
}
 0x9d4   :  { %1723 = dma.vmem_to_hbm [thread:$0]  %s1721_s21, 128, %s3536_s9, [#allocation4]  }
 0x9d5   :  { %2934 = dma.done.wait [#allocation4], 128  }
 0x9d6   :  { %2935 = vsyncadd [#allocation4], 4294967168 }
 0x9d7   :  { %1727 = vsyncpa [#allocation3], 1 }
 0x9d8   :  { %1728 = vsyncpa [#allocation6], 1 }
 0x9d9   :  { %1729 = vsyncpa [#allocation9], 1 }
 0x9da   :  { %1730 = vsyncpa [#allocation12], 1 }
 0x9db   :  { %1731 = vsyncpa [#allocation4], 1 }

</bundles_post_ra>
